<compile_context>
chip_gen: v7x
topology: tpu7x:2x2x1
jax: 0.10.0
libtpu: 0.0.40
codegen_flags: <defaults>
</compile_context>

<pallas_src>
import jax
import jax.numpy as jnp
from jax.experimental import pallas as pl
from jax.experimental.pallas import tpu as pltpu


# ----------------------------- fused Pallas kernel --------------------------

def _lenet_kernel(x_ref, t1_ref, c1b_ref, p1_ref, q1_ref,
                  t2_ref, c2b_ref, p2_ref, q2_ref,
                  w3_ref, b3_ref, w4_ref, b4_ref, w5_ref, b5_ref,
                  o_ref):
    """Whole LeNet forward for ONE image; everything stays in VMEM/vregs.

    Activation layout is always [rows, cols] = [H, W*C], so convolutions
    become banded (Toeplitz) matmuls along the lane dim and 2x2 avg-pooling
    becomes two matmuls with constant 0.5 pooling matrices.
    """
    f32, bf16 = jnp.float32, jnp.bfloat16

    def mm(a, b):  # MXU matmul: bf16 operands, f32 accumulation
        return jnp.dot(a.astype(bf16), b.astype(bf16),
                       preferred_element_type=f32)

    def sigmoid(v):  # f32 (EUP exp + VPU)
        return 1.0 / (1.0 + jnp.exp(-v))

    x = x_ref[0]                                          # [32, 32] padded img

    # conv1 (1->6, k=5, pad=2) + sigmoid: 5 banded matmuls over ky.
    acc1 = jnp.zeros((28, 28 * 6), f32)
    for ky in range(5):
        acc1 = acc1 + mm(x[ky:ky + 28, :], t1_ref[ky])    # [28,32]@[32,168]
    y1 = sigmoid(acc1 + c1b_ref[...])                     # [28, 168]

    # pool1 (AvgPool2d 2x2): P1 @ y1 @ Q1.
    y1p = mm(mm(p1_ref[...], y1), q1_ref[...])            # [14, 84]

    # conv2 (6->16, k=5, valid) + sigmoid: 5 banded matmuls over ky.
    acc2 = jnp.zeros((10, 10 * 16), f32)
    for ky in range(5):
        acc2 = acc2 + mm(y1p[ky:ky + 10, :], t2_ref[ky])  # [10,84]@[84,160]
    y2 = sigmoid(acc2 + c2b_ref[...])                     # [10, 160]

    # pool2 (AvgPool2d 2x2).
    y2p = mm(mm(p2_ref[...], y2), q2_ref[...])            # [5, 80]

    # fc1: contract the (h, w*16+o) layout against the permuted torch weight.
    acc3 = jnp.zeros((1, 120), f32)
    for h in range(5):
        acc3 = acc3 + mm(y2p[h:h + 1, :], w3_ref[h])      # [1,80]@[80,120]
    h1 = sigmoid(acc3 + b3_ref[...])                      # [1, 120]

    h2 = sigmoid(mm(h1, w4_ref[...]) + b4_ref[...])       # [1, 84]

    logits = mm(h2, w5_ref[...]) + b5_ref[...]            # [1, 10]
    z = logits - jnp.max(logits, axis=-1, keepdims=True)  # stable softmax
    e = jnp.exp(z)
    probs = e / jnp.sum(e, axis=-1, keepdims=True)
    o_ref[0] = probs.astype(o_ref.dtype)


# ----------------------- one-time parameter preparation ---------------------

def _pool_rows(n_out):
    """[n_out, 2*n_out] matrix averaging adjacent row pairs (factor 0.5)."""
    i = jnp.arange(n_out)[:, None]
    j = jnp.arange(2 * n_out)[None, :]
    return (0.5 * ((j // 2) == i)).astype(jnp.bfloat16)


def _pool_cols(n_out, c):
    """[2*n_out*c, n_out*c] matrix averaging adjacent W column groups."""
    w_in = jnp.arange(2 * n_out)
    w_out = jnp.arange(n_out)
    m = 0.5 * ((w_in[:, None] // 2) == w_out[None, :]).astype(jnp.float32)
    eye = jnp.eye(c, dtype=jnp.float32)
    q = m[:, None, :, None] * eye[None, :, None, :]        # [2n, c, n, c]
    return q.reshape(2 * n_out * c, n_out * c).astype(jnp.bfloat16)


def _band_conv1(w1):
    """[5, 32, 28*6] banded matrices: conv along W as a matmul, one per ky."""
    w_in = jnp.arange(32)[:, None]
    w_out = jnp.arange(28)[None, :]
    kx = w_in - w_out
    valid = ((kx >= 0) & (kx < 5)).astype(jnp.float32)      # [32, 28]
    kxc = jnp.clip(kx, 0, 4)
    w1k = jnp.transpose(w1[:, 0, :, :], (1, 2, 0))          # [ky, kx, o]
    t1 = w1k[:, kxc, :] * valid[None, :, :, None]           # [5, 32, 28, 6]
    return t1.reshape(5, 32, 28 * 6).astype(jnp.bfloat16)


def _band_conv2(w2):
    """[5, 14*6, 10*16] banded matrices for conv2 (rows=(w_in, c_in))."""
    w_in = jnp.arange(14)[:, None]
    w_out = jnp.arange(10)[None, :]
    kx = w_in - w_out
    valid = ((kx >= 0) & (kx < 5)).astype(jnp.float32)      # [14, 10]
    kxc = jnp.clip(kx, 0, 4)
    w2k = jnp.transpose(w2, (2, 3, 1, 0))                   # [ky, kx, c, o]
    t2 = w2k[:, kxc, :, :] * valid[None, :, :, None, None]  # [5,14,10,6,16]
    t2 = jnp.transpose(t2, (0, 1, 3, 2, 4))                 # [5,14,6,10,16]
    return t2.reshape(5, 14 * 6, 10 * 16).astype(jnp.bfloat16)


def prepare_params(params):
    """One-time weight preprocessing (hoisted out of the forward pass)."""
    (w1, b1, w2, b2, w3, b3, w4, b4, w5, b5) = params
    f32, bf16 = jnp.float32, jnp.bfloat16
    t1 = _band_conv1(w1)
    c1b = jnp.tile(b1, 28).reshape(1, 28 * 6).astype(f32)   # bias per (w, o)
    p1, q1 = _pool_rows(14), _pool_cols(14, 6)
    t2 = _band_conv2(w2)
    c2b = jnp.tile(b2, 10).reshape(1, 10 * 16).astype(f32)
    p2, q2 = _pool_rows(5), _pool_cols(5, 16)
    # fc1 weight permuted from torch's flatten order (o*25 + h*5 + w) to the
    # kernel's (h, w*16 + o) activation layout.
    w3r = jnp.transpose(w3.reshape(120, 16, 5, 5), (2, 3, 1, 0))
    w3r = w3r.reshape(5, 80, 120).astype(bf16)
    return (t1, c1b, p1, q1, t2, c2b, p2, q2,
            w3r, b3.reshape(1, 120).astype(f32),
            w4.T.astype(bf16), b4.reshape(1, 84).astype(f32),
            w5.T.astype(bf16), b5.reshape(1, 10).astype(f32))


# --------------------------------- forward ----------------------------------

def lenet_forward(x_nchw, prepped):
    """Exact forward of the PyTorch LeNet module. x: [B,1,28,28] -> [B,10]."""
    B = x_nchw.shape[0]
    xp = jnp.pad(x_nchw[:, 0, :, :], ((0, 0), (2, 2), (2, 2)))  # conv1 pad=2

    def _const(nd):
        return lambda b: (0,) * nd

    in_specs = [pl.BlockSpec((1, 32, 32), lambda b: (b, 0, 0))]
    in_specs += [pl.BlockSpec(p.shape, _const(p.ndim)) for p in prepped]

    out = pl.pallas_call(
        _lenet_kernel,
        out_shape=jax.ShapeDtypeStruct((B, 1, 10), jnp.float32),
        grid=(B,),                                # one image per grid step
        in_specs=in_specs,
        out_specs=pl.BlockSpec((1, 1, 10), lambda b: (b, 0, 0)),
        compiler_params=pltpu.CompilerParams(
            dimension_semantics=("parallel",)),   # v7x: 2 TCs split the batch
    )(xp, *prepped)
    return out.reshape(B, 10)


# ----------------------- pure-JAX reference (self-check) --------------------

def lenet_reference(x_nchw, params):
    (w1, b1, w2, b2, w3, b3, w4, b4, w5, b5) = params
    dn = ("NCHW", "OIHW", "NCHW")
    y = jax.lax.conv_general_dilated(x_nchw, w1, (1, 1), ((2, 2), (2, 2)),
                                     dimension_numbers=dn)
    y = jax.nn.sigmoid(y + b1.reshape(1, 6, 1, 1))
    y = jax.lax.reduce_window(y, 0.0, jax.lax.add,
                              (1, 1, 2, 2), (1, 1, 2, 2), "VALID") / 4.0
    y = jax.lax.conv_general_dilated(y, w2, (1, 1), ((0, 0), (0, 0)),
                                     dimension_numbers=dn)
    y = jax.nn.sigmoid(y + b2.reshape(1, 16, 1, 1))
    y = jax.lax.reduce_window(y, 0.0, jax.lax.add,
                              (1, 1, 2, 2), (1, 1, 2, 2), "VALID") / 4.0
    flat = y.reshape(y.shape[0], -1)
    h1 = jax.nn.sigmoid(flat @ w3.T + b3)
    h2 = jax.nn.sigmoid(h1 @ w4.T + b4)
    return jax.nn.softmax(h2 @ w5.T + b5, axis=-1)


def init_params(key):
    """Deterministic init matching torch default U(-1/sqrt(fan_in), +...)."""
    def uinit(k, shape, fan_in):
        bound = 1.0 / (fan_in ** 0.5)
        return jax.random.uniform(k, shape, jnp.float32, -bound, bound)

    ks = jax.random.split(key, 10)
    w1 = uinit(ks[0], (6, 1, 5, 5), 25);    b1 = uinit(ks[1], (6,), 25)
    w2 = uinit(ks[2], (16, 6, 5, 5), 150);  b2 = uinit(ks[3], (16,), 150)
    w3 = uinit(ks[4], (120, 400), 400);     b3 = uinit(ks[5], (120,), 400)
    w4 = uinit(ks[6], (84, 120), 120);      b4 = uinit(ks[7], (84,), 120)
    w5 = uinit(ks[8], (10, 84), 84);        b5 = uinit(ks[9], (10,), 84)
    return (w1, b1, w2, b2, w3, b3, w4, b4, w5, b5)


if __name__ == "__main__":
    key = jax.random.PRNGKey(0)
    pkey, xkey = jax.random.split(key)
    params = init_params(pkey)
    prepped = prepare_params(params)          # one-time weight prep (hoisted)

    # MNIST-shaped input (28x28 is required by fc1 = Linear(16*5*5, 120)).
    x = jax.random.normal(xkey, (2, 1, 28, 28), dtype=jnp.float32)

    out = jax.jit(lenet_forward)(x, prepped)
    out = jax.block_until_ready(out)

    assert out.shape == (2, 10), out.shape
    assert bool(jnp.all(jnp.isfinite(out)))
    # softmax rows must sum to 1
    assert bool(jnp.allclose(jnp.sum(out, axis=1), 1.0, atol=1e-5))
    # numerics vs. pure-JAX f32 reference (bf16 MXU operands -> loose tol)
    ref = jax.jit(lenet_reference)(x, params)
    assert bool(jnp.allclose(out, ref, atol=5e-2)), (out, ref)
    print("KERNEL_OK")
</pallas_src>

<mosaic_0001>
module attributes {stable_mosaic.version = 11 : i64} {
  func.func @_lenet_kernel(%arg0: i32, %arg1: memref<1x32x32xf32, #tpu.memory_space<vmem>>, %arg2: memref<5x32x168xbf16, #tpu.memory_space<vmem>>, %arg3: memref<1x168xf32, #tpu.memory_space<vmem>>, %arg4: memref<14x28xbf16, #tpu.memory_space<vmem>>, %arg5: memref<168x84xbf16, #tpu.memory_space<vmem>>, %arg6: memref<5x84x160xbf16, #tpu.memory_space<vmem>>, %arg7: memref<1x160xf32, #tpu.memory_space<vmem>>, %arg8: memref<5x10xbf16, #tpu.memory_space<vmem>>, %arg9: memref<160x80xbf16, #tpu.memory_space<vmem>>, %arg10: memref<5x80x120xbf16, #tpu.memory_space<vmem>>, %arg11: memref<1x120xf32, #tpu.memory_space<vmem>>, %arg12: memref<120x84xbf16, #tpu.memory_space<vmem>>, %arg13: memref<1x84xf32, #tpu.memory_space<vmem>>, %arg14: memref<84x10xbf16, #tpu.memory_space<vmem>>, %arg15: memref<1x10xf32, #tpu.memory_space<vmem>>, %arg16: memref<1x1x10xf32, #tpu.memory_space<vmem>>) attributes {dimension_semantics = [#tpu.dimension_semantics<parallel>], iteration_bounds = array<i64: 2>, scalar_prefetch = 0 : i64, scratch_operands = 0 : i64, tpu.core_type = #tpu.core_type<tc>, window_params = [{transform_indices = @transform_0, window_bounds = array<i64: 1, 32, 32>}, {pipeline_mode = #tpu.pipeline_mode<synchronous>, transform_indices = @transform_1, window_bounds = array<i64: 5, 32, 168>}, {pipeline_mode = #tpu.pipeline_mode<synchronous>, transform_indices = @transform_2, window_bounds = array<i64: 1, 168>}, {pipeline_mode = #tpu.pipeline_mode<synchronous>, transform_indices = @transform_3, window_bounds = array<i64: 14, 28>}, {pipeline_mode = #tpu.pipeline_mode<synchronous>, transform_indices = @transform_4, window_bounds = array<i64: 168, 84>}, {pipeline_mode = #tpu.pipeline_mode<synchronous>, transform_indices = @transform_5, window_bounds = array<i64: 5, 84, 160>}, {pipeline_mode = #tpu.pipeline_mode<synchronous>, transform_indices = @transform_6, window_bounds = array<i64: 1, 160>}, {pipeline_mode = #tpu.pipeline_mode<synchronous>, transform_indices = @transform_7, window_bounds = array<i64: 5, 10>}, {pipeline_mode = #tpu.pipeline_mode<synchronous>, transform_indices = @transform_8, window_bounds = array<i64: 160, 80>}, {pipeline_mode = #tpu.pipeline_mode<synchronous>, transform_indices = @transform_9, window_bounds = array<i64: 5, 80, 120>}, {pipeline_mode = #tpu.pipeline_mode<synchronous>, transform_indices = @transform_10, window_bounds = array<i64: 1, 120>}, {pipeline_mode = #tpu.pipeline_mode<synchronous>, transform_indices = @transform_11, window_bounds = array<i64: 120, 84>}, {pipeline_mode = #tpu.pipeline_mode<synchronous>, transform_indices = @transform_12, window_bounds = array<i64: 1, 84>}, {pipeline_mode = #tpu.pipeline_mode<synchronous>, transform_indices = @transform_13, window_bounds = array<i64: 84, 10>}, {pipeline_mode = #tpu.pipeline_mode<synchronous>, transform_indices = @transform_14, window_bounds = array<i64: 1, 10>}, {transform_indices = @transform_15, window_bounds = array<i64: 1, 1, 10>}]} {
    %c0 = arith.constant 0 : index
    %c0_0 = arith.constant 0 : index
    %c0_1 = arith.constant 0 : index
    %0 = vector.load %arg1[%c0, %c0_0, %c0_1] : memref<1x32x32xf32, #tpu.memory_space<vmem>>, vector<1x32x32xf32>
    %1 = vector.shape_cast %0 : vector<1x32x32xf32> to vector<32x32xf32>
    %cst = arith.constant 0.000000e+00 : f32
    %2 = vector.broadcast %cst : f32 to vector<28x168xf32>
    %3 = vector.extract_strided_slice %1 {offsets = [0, 0], sizes = [28, 32], strides = [1, 1]} : vector<32x32xf32> to vector<28x32xf32>
    %c0_2 = arith.constant 0 : index
    %c0_3 = arith.constant 0 : index
    %c0_4 = arith.constant 0 : index
    %4 = vector.load %arg2[%c0_2, %c0_3, %c0_4] : memref<5x32x168xbf16, #tpu.memory_space<vmem>>, vector<1x32x168xbf16>
    %5 = vector.shape_cast %4 : vector<1x32x168xbf16> to vector<32x168xbf16>
    %6 = arith.truncf %3 : vector<28x32xf32> to vector<28x32xbf16>
    %cst_5 = arith.constant dense<0.000000e+00> : vector<28x168xf32>
    %7 = tpu.matmul %6, %5, %cst_5 {dimension_numbers = #tpu.dot_dimension_numbers<[1], [0], [0], [1], [0, 0, 1, 1], [], []>} : vector<28x32xbf16>, vector<32x168xbf16>, vector<28x168xf32> -> vector<28x168xf32>
    %8 = arith.addf %2, %7 : vector<28x168xf32>
    %9 = vector.extract_strided_slice %1 {offsets = [1, 0], sizes = [28, 32], strides = [1, 1]} : vector<32x32xf32> to vector<28x32xf32>
    %c1 = arith.constant 1 : index
    %c0_6 = arith.constant 0 : index
    %c0_7 = arith.constant 0 : index
    %10 = vector.load %arg2[%c1, %c0_6, %c0_7] : memref<5x32x168xbf16, #tpu.memory_space<vmem>>, vector<1x32x168xbf16>
    %11 = vector.shape_cast %10 : vector<1x32x168xbf16> to vector<32x168xbf16>
    %12 = arith.truncf %9 : vector<28x32xf32> to vector<28x32xbf16>
    %cst_8 = arith.constant dense<0.000000e+00> : vector<28x168xf32>
    %13 = tpu.matmul %12, %11, %cst_8 {dimension_numbers = #tpu.dot_dimension_numbers<[1], [0], [0], [1], [0, 0, 1, 1], [], []>} : vector<28x32xbf16>, vector<32x168xbf16>, vector<28x168xf32> -> vector<28x168xf32>
    %14 = arith.addf %8, %13 : vector<28x168xf32>
    %15 = vector.extract_strided_slice %1 {offsets = [2, 0], sizes = [28, 32], strides = [1, 1]} : vector<32x32xf32> to vector<28x32xf32>
    %c2 = arith.constant 2 : index
    %c0_9 = arith.constant 0 : index
    %c0_10 = arith.constant 0 : index
    %16 = vector.load %arg2[%c2, %c0_9, %c0_10] : memref<5x32x168xbf16, #tpu.memory_space<vmem>>, vector<1x32x168xbf16>
    %17 = vector.shape_cast %16 : vector<1x32x168xbf16> to vector<32x168xbf16>
    %18 = arith.truncf %15 : vector<28x32xf32> to vector<28x32xbf16>
    %cst_11 = arith.constant dense<0.000000e+00> : vector<28x168xf32>
    %19 = tpu.matmul %18, %17, %cst_11 {dimension_numbers = #tpu.dot_dimension_numbers<[1], [0], [0], [1], [0, 0, 1, 1], [], []>} : vector<28x32xbf16>, vector<32x168xbf16>, vector<28x168xf32> -> vector<28x168xf32>
    %20 = arith.addf %14, %19 : vector<28x168xf32>
    %21 = vector.extract_strided_slice %1 {offsets = [3, 0], sizes = [28, 32], strides = [1, 1]} : vector<32x32xf32> to vector<28x32xf32>
    %c3 = arith.constant 3 : index
    %c0_12 = arith.constant 0 : index
    %c0_13 = arith.constant 0 : index
    %22 = vector.load %arg2[%c3, %c0_12, %c0_13] : memref<5x32x168xbf16, #tpu.memory_space<vmem>>, vector<1x32x168xbf16>
    %23 = vector.shape_cast %22 : vector<1x32x168xbf16> to vector<32x168xbf16>
    %24 = arith.truncf %21 : vector<28x32xf32> to vector<28x32xbf16>
    %cst_14 = arith.constant dense<0.000000e+00> : vector<28x168xf32>
    %25 = tpu.matmul %24, %23, %cst_14 {dimension_numbers = #tpu.dot_dimension_numbers<[1], [0], [0], [1], [0, 0, 1, 1], [], []>} : vector<28x32xbf16>, vector<32x168xbf16>, vector<28x168xf32> -> vector<28x168xf32>
    %26 = arith.addf %20, %25 : vector<28x168xf32>
    %27 = vector.extract_strided_slice %1 {offsets = [4, 0], sizes = [28, 32], strides = [1, 1]} : vector<32x32xf32> to vector<28x32xf32>
    %c4 = arith.constant 4 : index
    %c0_15 = arith.constant 0 : index
    %c0_16 = arith.constant 0 : index
    %28 = vector.load %arg2[%c4, %c0_15, %c0_16] : memref<5x32x168xbf16, #tpu.memory_space<vmem>>, vector<1x32x168xbf16>
    %29 = vector.shape_cast %28 : vector<1x32x168xbf16> to vector<32x168xbf16>
    %30 = arith.truncf %27 : vector<28x32xf32> to vector<28x32xbf16>
    %cst_17 = arith.constant dense<0.000000e+00> : vector<28x168xf32>
    %31 = tpu.matmul %30, %29, %cst_17 {dimension_numbers = #tpu.dot_dimension_numbers<[1], [0], [0], [1], [0, 0, 1, 1], [], []>} : vector<28x32xbf16>, vector<32x168xbf16>, vector<28x168xf32> -> vector<28x168xf32>
    %32 = arith.addf %26, %31 : vector<28x168xf32>
    %c0_18 = arith.constant 0 : index
    %c0_19 = arith.constant 0 : index
    %33 = vector.load %arg3[%c0_18, %c0_19] : memref<1x168xf32, #tpu.memory_space<vmem>>, vector<1x168xf32>
    %34 = vector.broadcast %33 : vector<1x168xf32> to vector<28x168xf32>
    %35 = arith.addf %32, %34 : vector<28x168xf32>
    %cst_20 = arith.constant 0.000000e+00 : f32
    %36 = vector.broadcast %cst_20 : f32 to vector<28x168xf32>
    %37 = arith.subf %36, %35 : vector<28x168xf32>
    %38 = math.exp %37 : vector<28x168xf32>
    %cst_21 = arith.constant 1.000000e+00 : f32
    %39 = vector.broadcast %cst_21 : f32 to vector<28x168xf32>
    %40 = arith.addf %39, %38 : vector<28x168xf32>
    %cst_22 = arith.constant 1.000000e+00 : f32
    %41 = vector.broadcast %cst_22 : f32 to vector<28x168xf32>
    %42 = arith.divf %41, %40 : vector<28x168xf32>
    %c0_23 = arith.constant 0 : index
    %c0_24 = arith.constant 0 : index
    %43 = vector.load %arg4[%c0_23, %c0_24] : memref<14x28xbf16, #tpu.memory_space<vmem>>, vector<14x28xbf16>
    %44 = arith.truncf %42 : vector<28x168xf32> to vector<28x168xbf16>
    %cst_25 = arith.constant dense<0.000000e+00> : vector<14x168xf32>
    %45 = tpu.matmul %43, %44, %cst_25 {dimension_numbers = #tpu.dot_dimension_numbers<[1], [0], [0], [1], [0, 0, 1, 1], [], []>} : vector<14x28xbf16>, vector<28x168xbf16>, vector<14x168xf32> -> vector<14x168xf32>
    %c0_26 = arith.constant 0 : index
    %c0_27 = arith.constant 0 : index
    %46 = vector.load %arg5[%c0_26, %c0_27] : memref<168x84xbf16, #tpu.memory_space<vmem>>, vector<168x84xbf16>
    %47 = arith.truncf %45 : vector<14x168xf32> to vector<14x168xbf16>
    %cst_28 = arith.constant dense<0.000000e+00> : vector<14x84xf32>
    %48 = tpu.matmul %47, %46, %cst_28 {dimension_numbers = #tpu.dot_dimension_numbers<[1], [0], [0], [1], [0, 0, 1, 1], [], []>} : vector<14x168xbf16>, vector<168x84xbf16>, vector<14x84xf32> -> vector<14x84xf32>
    %cst_29 = arith.constant 0.000000e+00 : f32
    %49 = vector.broadcast %cst_29 : f32 to vector<10x160xf32>
    %50 = vector.extract_strided_slice %48 {offsets = [0, 0], sizes = [10, 84], strides = [1, 1]} : vector<14x84xf32> to vector<10x84xf32>
    %c0_30 = arith.constant 0 : index
    %c0_31 = arith.constant 0 : index
    %c0_32 = arith.constant 0 : index
    %51 = vector.load %arg6[%c0_30, %c0_31, %c0_32] : memref<5x84x160xbf16, #tpu.memory_space<vmem>>, vector<1x84x160xbf16>
    %52 = vector.shape_cast %51 : vector<1x84x160xbf16> to vector<84x160xbf16>
    %53 = arith.truncf %50 : vector<10x84xf32> to vector<10x84xbf16>
    %cst_33 = arith.constant dense<0.000000e+00> : vector<10x160xf32>
    %54 = tpu.matmul %53, %52, %cst_33 {dimension_numbers = #tpu.dot_dimension_numbers<[1], [0], [0], [1], [0, 0, 1, 1], [], []>} : vector<10x84xbf16>, vector<84x160xbf16>, vector<10x160xf32> -> vector<10x160xf32>
    %55 = arith.addf %49, %54 : vector<10x160xf32>
    %56 = vector.extract_strided_slice %48 {offsets = [1, 0], sizes = [10, 84], strides = [1, 1]} : vector<14x84xf32> to vector<10x84xf32>
    %c1_34 = arith.constant 1 : index
    %c0_35 = arith.constant 0 : index
    %c0_36 = arith.constant 0 : index
    %57 = vector.load %arg6[%c1_34, %c0_35, %c0_36] : memref<5x84x160xbf16, #tpu.memory_space<vmem>>, vector<1x84x160xbf16>
    %58 = vector.shape_cast %57 : vector<1x84x160xbf16> to vector<84x160xbf16>
    %59 = arith.truncf %56 : vector<10x84xf32> to vector<10x84xbf16>
    %cst_37 = arith.constant dense<0.000000e+00> : vector<10x160xf32>
    %60 = tpu.matmul %59, %58, %cst_37 {dimension_numbers = #tpu.dot_dimension_numbers<[1], [0], [0], [1], [0, 0, 1, 1], [], []>} : vector<10x84xbf16>, vector<84x160xbf16>, vector<10x160xf32> -> vector<10x160xf32>
    %61 = arith.addf %55, %60 : vector<10x160xf32>
    %62 = vector.extract_strided_slice %48 {offsets = [2, 0], sizes = [10, 84], strides = [1, 1]} : vector<14x84xf32> to vector<10x84xf32>
    %c2_38 = arith.constant 2 : index
    %c0_39 = arith.constant 0 : index
    %c0_40 = arith.constant 0 : index
    %63 = vector.load %arg6[%c2_38, %c0_39, %c0_40] : memref<5x84x160xbf16, #tpu.memory_space<vmem>>, vector<1x84x160xbf16>
    %64 = vector.shape_cast %63 : vector<1x84x160xbf16> to vector<84x160xbf16>
    %65 = arith.truncf %62 : vector<10x84xf32> to vector<10x84xbf16>
    %cst_41 = arith.constant dense<0.000000e+00> : vector<10x160xf32>
    %66 = tpu.matmul %65, %64, %cst_41 {dimension_numbers = #tpu.dot_dimension_numbers<[1], [0], [0], [1], [0, 0, 1, 1], [], []>} : vector<10x84xbf16>, vector<84x160xbf16>, vector<10x160xf32> -> vector<10x160xf32>
    %67 = arith.addf %61, %66 : vector<10x160xf32>
    %68 = vector.extract_strided_slice %48 {offsets = [3, 0], sizes = [10, 84], strides = [1, 1]} : vector<14x84xf32> to vector<10x84xf32>
    %c3_42 = arith.constant 3 : index
    %c0_43 = arith.constant 0 : index
    %c0_44 = arith.constant 0 : index
    %69 = vector.load %arg6[%c3_42, %c0_43, %c0_44] : memref<5x84x160xbf16, #tpu.memory_space<vmem>>, vector<1x84x160xbf16>
    %70 = vector.shape_cast %69 : vector<1x84x160xbf16> to vector<84x160xbf16>
    %71 = arith.truncf %68 : vector<10x84xf32> to vector<10x84xbf16>
    %cst_45 = arith.constant dense<0.000000e+00> : vector<10x160xf32>
    %72 = tpu.matmul %71, %70, %cst_45 {dimension_numbers = #tpu.dot_dimension_numbers<[1], [0], [0], [1], [0, 0, 1, 1], [], []>} : vector<10x84xbf16>, vector<84x160xbf16>, vector<10x160xf32> -> vector<10x160xf32>
    %73 = arith.addf %67, %72 : vector<10x160xf32>
    %74 = vector.extract_strided_slice %48 {offsets = [4, 0], sizes = [10, 84], strides = [1, 1]} : vector<14x84xf32> to vector<10x84xf32>
    %c4_46 = arith.constant 4 : index
    %c0_47 = arith.constant 0 : index
    %c0_48 = arith.constant 0 : index
    %75 = vector.load %arg6[%c4_46, %c0_47, %c0_48] : memref<5x84x160xbf16, #tpu.memory_space<vmem>>, vector<1x84x160xbf16>
    %76 = vector.shape_cast %75 : vector<1x84x160xbf16> to vector<84x160xbf16>
    %77 = arith.truncf %74 : vector<10x84xf32> to vector<10x84xbf16>
    %cst_49 = arith.constant dense<0.000000e+00> : vector<10x160xf32>
    %78 = tpu.matmul %77, %76, %cst_49 {dimension_numbers = #tpu.dot_dimension_numbers<[1], [0], [0], [1], [0, 0, 1, 1], [], []>} : vector<10x84xbf16>, vector<84x160xbf16>, vector<10x160xf32> -> vector<10x160xf32>
    %79 = arith.addf %73, %78 : vector<10x160xf32>
    %c0_50 = arith.constant 0 : index
    %c0_51 = arith.constant 0 : index
    %80 = vector.load %arg7[%c0_50, %c0_51] : memref<1x160xf32, #tpu.memory_space<vmem>>, vector<1x160xf32>
    %81 = vector.broadcast %80 : vector<1x160xf32> to vector<10x160xf32>
    %82 = arith.addf %79, %81 : vector<10x160xf32>
    %cst_52 = arith.constant 0.000000e+00 : f32
    %83 = vector.broadcast %cst_52 : f32 to vector<10x160xf32>
    %84 = arith.subf %83, %82 : vector<10x160xf32>
    %85 = math.exp %84 : vector<10x160xf32>
    %cst_53 = arith.constant 1.000000e+00 : f32
    %86 = vector.broadcast %cst_53 : f32 to vector<10x160xf32>
    %87 = arith.addf %86, %85 : vector<10x160xf32>
    %cst_54 = arith.constant 1.000000e+00 : f32
    %88 = vector.broadcast %cst_54 : f32 to vector<10x160xf32>
    %89 = arith.divf %88, %87 : vector<10x160xf32>
    %c0_55 = arith.constant 0 : index
    %c0_56 = arith.constant 0 : index
    %90 = vector.load %arg8[%c0_55, %c0_56] : memref<5x10xbf16, #tpu.memory_space<vmem>>, vector<5x10xbf16>
    %91 = arith.truncf %89 : vector<10x160xf32> to vector<10x160xbf16>
    %cst_57 = arith.constant dense<0.000000e+00> : vector<5x160xf32>
    %92 = tpu.matmul %90, %91, %cst_57 {dimension_numbers = #tpu.dot_dimension_numbers<[1], [0], [0], [1], [0, 0, 1, 1], [], []>} : vector<5x10xbf16>, vector<10x160xbf16>, vector<5x160xf32> -> vector<5x160xf32>
    %c0_58 = arith.constant 0 : index
    %c0_59 = arith.constant 0 : index
    %93 = vector.load %arg9[%c0_58, %c0_59] : memref<160x80xbf16, #tpu.memory_space<vmem>>, vector<160x80xbf16>
    %94 = arith.truncf %92 : vector<5x160xf32> to vector<5x160xbf16>
    %cst_60 = arith.constant dense<0.000000e+00> : vector<5x80xf32>
    %95 = tpu.matmul %94, %93, %cst_60 {dimension_numbers = #tpu.dot_dimension_numbers<[1], [0], [0], [1], [0, 0, 1, 1], [], []>} : vector<5x160xbf16>, vector<160x80xbf16>, vector<5x80xf32> -> vector<5x80xf32>
    %cst_61 = arith.constant 0.000000e+00 : f32
    %96 = vector.broadcast %cst_61 : f32 to vector<1x120xf32>
    %97 = vector.extract_strided_slice %95 {offsets = [0, 0], sizes = [1, 80], strides = [1, 1]} : vector<5x80xf32> to vector<1x80xf32>
    %c0_62 = arith.constant 0 : index
    %c0_63 = arith.constant 0 : index
    %c0_64 = arith.constant 0 : index
    %98 = vector.load %arg10[%c0_62, %c0_63, %c0_64] : memref<5x80x120xbf16, #tpu.memory_space<vmem>>, vector<1x80x120xbf16>
    %99 = vector.shape_cast %98 : vector<1x80x120xbf16> to vector<80x120xbf16>
    %100 = arith.truncf %97 : vector<1x80xf32> to vector<1x80xbf16>
    %cst_65 = arith.constant dense<0.000000e+00> : vector<1x120xf32>
    %101 = tpu.matmul %100, %99, %cst_65 {dimension_numbers = #tpu.dot_dimension_numbers<[1], [0], [0], [1], [0, 0, 1, 1], [], []>} : vector<1x80xbf16>, vector<80x120xbf16>, vector<1x120xf32> -> vector<1x120xf32>
    %102 = arith.addf %96, %101 : vector<1x120xf32>
    %103 = vector.extract_strided_slice %95 {offsets = [1, 0], sizes = [1, 80], strides = [1, 1]} : vector<5x80xf32> to vector<1x80xf32>
    %c1_66 = arith.constant 1 : index
    %c0_67 = arith.constant 0 : index
    %c0_68 = arith.constant 0 : index
    %104 = vector.load %arg10[%c1_66, %c0_67, %c0_68] : memref<5x80x120xbf16, #tpu.memory_space<vmem>>, vector<1x80x120xbf16>
    %105 = vector.shape_cast %104 : vector<1x80x120xbf16> to vector<80x120xbf16>
    %106 = arith.truncf %103 : vector<1x80xf32> to vector<1x80xbf16>
    %cst_69 = arith.constant dense<0.000000e+00> : vector<1x120xf32>
    %107 = tpu.matmul %106, %105, %cst_69 {dimension_numbers = #tpu.dot_dimension_numbers<[1], [0], [0], [1], [0, 0, 1, 1], [], []>} : vector<1x80xbf16>, vector<80x120xbf16>, vector<1x120xf32> -> vector<1x120xf32>
    %108 = arith.addf %102, %107 : vector<1x120xf32>
    %109 = vector.extract_strided_slice %95 {offsets = [2, 0], sizes = [1, 80], strides = [1, 1]} : vector<5x80xf32> to vector<1x80xf32>
    %c2_70 = arith.constant 2 : index
    %c0_71 = arith.constant 0 : index
    %c0_72 = arith.constant 0 : index
    %110 = vector.load %arg10[%c2_70, %c0_71, %c0_72] : memref<5x80x120xbf16, #tpu.memory_space<vmem>>, vector<1x80x120xbf16>
    %111 = vector.shape_cast %110 : vector<1x80x120xbf16> to vector<80x120xbf16>
    %112 = arith.truncf %109 : vector<1x80xf32> to vector<1x80xbf16>
    %cst_73 = arith.constant dense<0.000000e+00> : vector<1x120xf32>
    %113 = tpu.matmul %112, %111, %cst_73 {dimension_numbers = #tpu.dot_dimension_numbers<[1], [0], [0], [1], [0, 0, 1, 1], [], []>} : vector<1x80xbf16>, vector<80x120xbf16>, vector<1x120xf32> -> vector<1x120xf32>
    %114 = arith.addf %108, %113 : vector<1x120xf32>
    %115 = vector.extract_strided_slice %95 {offsets = [3, 0], sizes = [1, 80], strides = [1, 1]} : vector<5x80xf32> to vector<1x80xf32>
    %c3_74 = arith.constant 3 : index
    %c0_75 = arith.constant 0 : index
    %c0_76 = arith.constant 0 : index
    %116 = vector.load %arg10[%c3_74, %c0_75, %c0_76] : memref<5x80x120xbf16, #tpu.memory_space<vmem>>, vector<1x80x120xbf16>
    %117 = vector.shape_cast %116 : vector<1x80x120xbf16> to vector<80x120xbf16>
    %118 = arith.truncf %115 : vector<1x80xf32> to vector<1x80xbf16>
    %cst_77 = arith.constant dense<0.000000e+00> : vector<1x120xf32>
    %119 = tpu.matmul %118, %117, %cst_77 {dimension_numbers = #tpu.dot_dimension_numbers<[1], [0], [0], [1], [0, 0, 1, 1], [], []>} : vector<1x80xbf16>, vector<80x120xbf16>, vector<1x120xf32> -> vector<1x120xf32>
    %120 = arith.addf %114, %119 : vector<1x120xf32>
    %121 = vector.extract_strided_slice %95 {offsets = [4, 0], sizes = [1, 80], strides = [1, 1]} : vector<5x80xf32> to vector<1x80xf32>
    %c4_78 = arith.constant 4 : index
    %c0_79 = arith.constant 0 : index
    %c0_80 = arith.constant 0 : index
    %122 = vector.load %arg10[%c4_78, %c0_79, %c0_80] : memref<5x80x120xbf16, #tpu.memory_space<vmem>>, vector<1x80x120xbf16>
    %123 = vector.shape_cast %122 : vector<1x80x120xbf16> to vector<80x120xbf16>
    %124 = arith.truncf %121 : vector<1x80xf32> to vector<1x80xbf16>
    %cst_81 = arith.constant dense<0.000000e+00> : vector<1x120xf32>
    %125 = tpu.matmul %124, %123, %cst_81 {dimension_numbers = #tpu.dot_dimension_numbers<[1], [0], [0], [1], [0, 0, 1, 1], [], []>} : vector<1x80xbf16>, vector<80x120xbf16>, vector<1x120xf32> -> vector<1x120xf32>
    %126 = arith.addf %120, %125 : vector<1x120xf32>
    %c0_82 = arith.constant 0 : index
    %c0_83 = arith.constant 0 : index
    %127 = vector.load %arg11[%c0_82, %c0_83] : memref<1x120xf32, #tpu.memory_space<vmem>>, vector<1x120xf32>
    %128 = arith.addf %126, %127 : vector<1x120xf32>
    %cst_84 = arith.constant 0.000000e+00 : f32
    %129 = vector.broadcast %cst_84 : f32 to vector<1x120xf32>
    %130 = arith.subf %129, %128 : vector<1x120xf32>
    %131 = math.exp %130 : vector<1x120xf32>
    %cst_85 = arith.constant 1.000000e+00 : f32
    %132 = vector.broadcast %cst_85 : f32 to vector<1x120xf32>
    %133 = arith.addf %132, %131 : vector<1x120xf32>
    %cst_86 = arith.constant 1.000000e+00 : f32
    %134 = vector.broadcast %cst_86 : f32 to vector<1x120xf32>
    %135 = arith.divf %134, %133 : vector<1x120xf32>
    %c0_87 = arith.constant 0 : index
    %c0_88 = arith.constant 0 : index
    %136 = vector.load %arg12[%c0_87, %c0_88] : memref<120x84xbf16, #tpu.memory_space<vmem>>, vector<120x84xbf16>
    %137 = arith.truncf %135 : vector<1x120xf32> to vector<1x120xbf16>
    %cst_89 = arith.constant dense<0.000000e+00> : vector<1x84xf32>
    %138 = tpu.matmul %137, %136, %cst_89 {dimension_numbers = #tpu.dot_dimension_numbers<[1], [0], [0], [1], [0, 0, 1, 1], [], []>} : vector<1x120xbf16>, vector<120x84xbf16>, vector<1x84xf32> -> vector<1x84xf32>
    %c0_90 = arith.constant 0 : index
    %c0_91 = arith.constant 0 : index
    %139 = vector.load %arg13[%c0_90, %c0_91] : memref<1x84xf32, #tpu.memory_space<vmem>>, vector<1x84xf32>
    %140 = arith.addf %138, %139 : vector<1x84xf32>
    %cst_92 = arith.constant 0.000000e+00 : f32
    %141 = vector.broadcast %cst_92 : f32 to vector<1x84xf32>
    %142 = arith.subf %141, %140 : vector<1x84xf32>
    %143 = math.exp %142 : vector<1x84xf32>
    %cst_93 = arith.constant 1.000000e+00 : f32
    %144 = vector.broadcast %cst_93 : f32 to vector<1x84xf32>
    %145 = arith.addf %144, %143 : vector<1x84xf32>
    %cst_94 = arith.constant 1.000000e+00 : f32
    %146 = vector.broadcast %cst_94 : f32 to vector<1x84xf32>
    %147 = arith.divf %146, %145 : vector<1x84xf32>
    %c0_95 = arith.constant 0 : index
    %c0_96 = arith.constant 0 : index
    %148 = vector.load %arg14[%c0_95, %c0_96] : memref<84x10xbf16, #tpu.memory_space<vmem>>, vector<84x10xbf16>
    %149 = arith.truncf %147 : vector<1x84xf32> to vector<1x84xbf16>
    %cst_97 = arith.constant dense<0.000000e+00> : vector<1x10xf32>
    %150 = tpu.matmul %149, %148, %cst_97 {dimension_numbers = #tpu.dot_dimension_numbers<[1], [0], [0], [1], [0, 0, 1, 1], [], []>} : vector<1x84xbf16>, vector<84x10xbf16>, vector<1x10xf32> -> vector<1x10xf32>
    %c0_98 = arith.constant 0 : index
    %c0_99 = arith.constant 0 : index
    %151 = vector.load %arg15[%c0_98, %c0_99] : memref<1x10xf32, #tpu.memory_space<vmem>>, vector<1x10xf32>
    %152 = arith.addf %150, %151 : vector<1x10xf32>
    %cst_100 = arith.constant dense<0xFF800000> : vector<1xf32>
    %153 = vector.multi_reduction <maximumf>, %152, %cst_100 [1] : vector<1x10xf32> to vector<1xf32>
    %154 = vector.shape_cast %153 : vector<1xf32> to vector<1x1xf32>
    %155 = vector.broadcast %154 : vector<1x1xf32> to vector<1x10xf32>
    %156 = arith.subf %152, %155 : vector<1x10xf32>
    %157 = math.exp %156 : vector<1x10xf32>
    %cst_101 = arith.constant dense<0.000000e+00> : vector<1xf32>
    %158 = vector.multi_reduction <add>, %157, %cst_101 [1] : vector<1x10xf32> to vector<1xf32>
    %159 = vector.shape_cast %158 : vector<1xf32> to vector<1x1xf32>
    %160 = vector.broadcast %159 : vector<1x1xf32> to vector<1x10xf32>
    %161 = arith.divf %157, %160 : vector<1x10xf32>
    %c0_102 = arith.constant 0 : index
    %c0_103 = arith.constant 0 : index
    %c0_104 = arith.constant 0 : index
    %162 = vector.load %arg16[%c0_102, %c0_103, %c0_104] : memref<1x1x10xf32, #tpu.memory_space<vmem>>, vector<1x1x10xf32>
    %163 = vector.shape_cast %162 : vector<1x1x10xf32> to vector<1x10xf32>
    %164 = vector.shape_cast %161 : vector<1x10xf32> to vector<1x1x10xf32>
    tpu.vector_store %arg16[%c0_102, %c0_103, %c0_104], %164 {strides = array<i32>} : memref<1x1x10xf32, #tpu.memory_space<vmem>>, vector<1x1x10xf32>,
    return
  }
  func.func @transform_0(%arg0: i32) -> (i32, i32, i32) {
    %c0_i32 = arith.constant 0 : i32
    %c0_i32_0 = arith.constant 0 : i32
    %c0_i32_1 = arith.constant 0 : i32
    return %arg0, %c0_i32, %c0_i32_0 : i32, i32, i32
  }
  func.func @transform_1(%arg0: i32) -> (i32, i32, i32) {
    %c0_i32 = arith.constant 0 : i32
    %c0_i32_0 = arith.constant 0 : i32
    %c0_i32_1 = arith.constant 0 : i32
    %c0_i32_2 = arith.constant 0 : i32
    return %c0_i32, %c0_i32_0, %c0_i32_1 : i32, i32, i32
  }
  func.func @transform_2(%arg0: i32) -> (i32, i32) {
    %c0_i32 = arith.constant 0 : i32
    %c0_i32_0 = arith.constant 0 : i32
    %c0_i32_1 = arith.constant 0 : i32
    return %c0_i32, %c0_i32_0 : i32, i32
  }
  func.func @transform_3(%arg0: i32) -> (i32, i32) {
    %c0_i32 = arith.constant 0 : i32
    %c0_i32_0 = arith.constant 0 : i32
    %c0_i32_1 = arith.constant 0 : i32
    return %c0_i32, %c0_i32_0 : i32, i32
  }
  func.func @transform_4(%arg0: i32) -> (i32, i32) {
    %c0_i32 = arith.constant 0 : i32
    %c0_i32_0 = arith.constant 0 : i32
    %c0_i32_1 = arith.constant 0 : i32
    return %c0_i32, %c0_i32_0 : i32, i32
  }
  func.func @transform_5(%arg0: i32) -> (i32, i32, i32) {
    %c0_i32 = arith.constant 0 : i32
    %c0_i32_0 = arith.constant 0 : i32
    %c0_i32_1 = arith.constant 0 : i32
    %c0_i32_2 = arith.constant 0 : i32
    return %c0_i32, %c0_i32_0, %c0_i32_1 : i32, i32, i32
  }
  func.func @transform_6(%arg0: i32) -> (i32, i32) {
    %c0_i32 = arith.constant 0 : i32
    %c0_i32_0 = arith.constant 0 : i32
    %c0_i32_1 = arith.constant 0 : i32
    return %c0_i32, %c0_i32_0 : i32, i32
  }
  func.func @transform_7(%arg0: i32) -> (i32, i32) {
    %c0_i32 = arith.constant 0 : i32
    %c0_i32_0 = arith.constant 0 : i32
    %c0_i32_1 = arith.constant 0 : i32
    return %c0_i32, %c0_i32_0 : i32, i32
  }
  func.func @transform_8(%arg0: i32) -> (i32, i32) {
    %c0_i32 = arith.constant 0 : i32
    %c0_i32_0 = arith.constant 0 : i32
    %c0_i32_1 = arith.constant 0 : i32
    return %c0_i32, %c0_i32_0 : i32, i32
  }
  func.func @transform_9(%arg0: i32) -> (i32, i32, i32) {
    %c0_i32 = arith.constant 0 : i32
    %c0_i32_0 = arith.constant 0 : i32
    %c0_i32_1 = arith.constant 0 : i32
    %c0_i32_2 = arith.constant 0 : i32
    return %c0_i32, %c0_i32_0, %c0_i32_1 : i32, i32, i32
  }
  func.func @transform_10(%arg0: i32) -> (i32, i32) {
    %c0_i32 = arith.constant 0 : i32
    %c0_i32_0 = arith.constant 0 : i32
    %c0_i32_1 = arith.constant 0 : i32
    return %c0_i32, %c0_i32_0 : i32, i32
  }
  func.func @transform_11(%arg0: i32) -> (i32, i32) {
    %c0_i32 = arith.constant 0 : i32
    %c0_i32_0 = arith.constant 0 : i32
    %c0_i32_1 = arith.constant 0 : i32
    return %c0_i32, %c0_i32_0 : i32, i32
  }
  func.func @transform_12(%arg0: i32) -> (i32, i32) {
    %c0_i32 = arith.constant 0 : i32
    %c0_i32_0 = arith.constant 0 : i32
    %c0_i32_1 = arith.constant 0 : i32
    return %c0_i32, %c0_i32_0 : i32, i32
  }
  func.func @transform_13(%arg0: i32) -> (i32, i32) {
    %c0_i32 = arith.constant 0 : i32
    %c0_i32_0 = arith.constant 0 : i32
    %c0_i32_1 = arith.constant 0 : i32
    return %c0_i32, %c0_i32_0 : i32, i32
  }
  func.func @transform_14(%arg0: i32) -> (i32, i32) {
    %c0_i32 = arith.constant 0 : i32
    %c0_i32_0 = arith.constant 0 : i32
    %c0_i32_1 = arith.constant 0 : i32
    return %c0_i32, %c0_i32_0 : i32, i32
  }
  func.func @transform_15(%arg0: i32) -> (i32, i32, i32) {
    %c0_i32 = arith.constant 0 : i32
    %c0_i32_0 = arith.constant 0 : i32
    %c0_i32_1 = arith.constant 0 : i32
    return %arg0, %c0_i32, %c0_i32_0 : i32, i32, i32
  }
}

</mosaic_0001>

<bundles_post_ra>
// kernel: lenet_forward.1
= control target key start
LH: loop header
LB: loop body
LE: loop exit
PB: predicated region body
PF: predicated region fallthrough
CT: control target
= control target key end

     0   :  { %20 = vsyncpa [#allocation3], 0  ;;  %s4423_s0 = inlined_call_operand.vmem [shape: f32[2,32,32], index: 0, kind: input, shape index: {}]   ;;  %s4424_s1 = inlined_call_operand.vmem [shape: bf16[5,32,168], index: 1, kind: input, shape index: {}]   ;;  %s4425_s2 = inlined_call_operand.vmem [shape: f32[1,168], index: 2, kind: input, shape index: {}]   ;;  %s4426_s3 = inlined_call_operand.vmem [shape: bf16[14,28], index: 3, kind: input, shape index: {}]   ;;  %s4427_s4 = inlined_call_operand.vmem [shape: bf16[168,84], index: 4, kind: input, shape index: {}]   ;;  %s4428_s5 = inlined_call_operand.vmem [shape: bf16[5,84,160], index: 5, kind: input, shape index: {}]   ;;  %s4429_s6 = inlined_call_operand.vmem [shape: f32[1,160], index: 6, kind: input, shape index: {}]   ;;  %s4430_s7 = inlined_call_operand.vmem [shape: bf16[5,10], index: 7, kind: input, shape index: {}]   ;;  %s4431_s8 = inlined_call_operand.vmem [shape: bf16[160,80], index: 8, kind: input, shape index: {}]   ;;  %s4432_s9 = inlined_call_operand.vmem [shape: bf16[5,80,120], index: 9, kind: input, shape index: {}]   ;;  %s4433_s10 = inlined_call_operand.vmem [shape: f32[1,120], index: 10, kind: input, shape index: {}]   ;;  %s4434_s11 = inlined_call_operand.vmem [shape: bf16[120,84], index: 11, kind: input, shape index: {}]   ;;  %s4435_s12 = inlined_call_operand.vmem [shape: f32[1,84], index: 12, kind: input, shape index: {}]   ;;  %s4436_s13 = inlined_call_operand.vmem [shape: bf16[84,10], index: 13, kind: input, shape index: {}]   ;;  %s4437_s14 = inlined_call_operand.vmem [shape: f32[1,10], index: 14, kind: input, shape index: {}]   ;;  %s4438_s15 = inlined_call_operand.hbm [shape: f32[2,1,10], index: 15, kind: output, shape index: {}]  }
   0x1   :  { %22 = vsyncpa [#allocation3 + $0x1], 0  ;;  %s3720_s18 = smov 0   ;;  %s3722_s19 = smov 0  }
   0x2   :  { %s3724_s20 = smov 0   ;;  %s3726_s21 = smov 0  }
   0x3 LB: > { %4444 = sst [smem:[#allocation5_spill]] %s3622_s18  ;;  %s3741_s22 = sadd.s32 4294967295, %s3634_s21   ;;  %s3634_s21 = sphi %s3726_s21, %s4453_s21   ;;  %s3630_s20 = sphi %s3724_s20, %s4455_s20   ;;  %s3626_s19 = sphi %s3722_s19, %s4457_s19   ;;  %s3622_s18 = sphi %s3720_s18, %s4456_s18  }
   0x4   : > { %4445 = sst [smem:[#allocation6_spill]] %s3630_s20  ;;  %s2810_s23 = sadd.s32 4294967294, %s3634_s21  }
   0x5   : > { %s3745_s24 = sadd.s32 1, %s3634_s21   ;;  %s355_s25 = sadd.s32 1, %s3630_s20 }
   0x6   : > { %4446 = sst [smem:[#allocation7_spill]] %s3745_s24  ;;  %s352_s26 = ssub.s32 %s3634_s21, %s3745_s24 }
   0x7   : > { %p365_p0 = scmp.ne.s32.totalorder %s3630_s20, %s3626_s19  ;;  %p353_p1 = scmp.eq.s32.totalorder %s352_s26, 0 }
   0x8   : > { %p366_p2 = scmp.eq.s32.totalorder %s3741_s22, 1  ;;  %p371_p3 = scmp.ne.s32.totalorder %s3626_s19, %s3622_s18 }
   0x9   : > { %p372_p4 = scmp.eq.s32.totalorder %s2810_s23, 1  ;;  %p2813_p7 = scmp.ge.s32.totalorder %s3634_s21, 1 }
   0xa   : > { %s3756_s27 = scalar_select %p353_p1, %s3630_s20, %s355_s25  }
   0xb   : > { %p3758_p5 = por %p366_p2, %p365_p0  ;;  %p3762_p6 = por %p372_p4, %p371_p3 }
   0xc   : > { %4447 = sst [smem:[#allocation8_spill]] %s3756_s27  ;;  %p440_p8 = scmp.lt.s32.totalorder %s3634_s21, 3 }
   0xd   : > { %s4449_s29 = scalar_select %p3762_p6, 1, 0 }
   0xe   : > { %p441_p9 = pnand %p2813_p7, %p440_p8 }
   0xf   : > { %4450 = sst [smem:[#allocation9_spill]] %s4449_s29  ;;  %v3336_v0 = vld [vmem:[%s4424_s1 + $0x24] ss:$8 sps:$4 sm:$0xff] (!%p441_p9)   ;;  %p487_p10 = scmp.lt.s32.totalorder (!%p441_p9), %s3741_s22, 1  ;;  %v3338_v1 = vld [vmem:[%s4424_s1 + $0x20] ss:$8 sps:$4 sm:$0xff] (!%p441_p9)   ;;  %v977_v49 = vlaneseq (!%p441_p9) }
  0x10   : > { %444 = sbr.rel (%p441_p9) target bundleno = 2671 (0xa6f), region = 80  ;;  %v3636_v2 = vmov (!%p441_p9), 0   ;;  %551 = vmatprep.subr.bf16.mxu0 (!%p441_p9), %v3336_v0  ;;  %v3339_v3 = vld [vmem:[%s4424_s1 + $0x34] ss:$8 sps:$4 sm:$0xff] (!%p441_p9)   ;;  %v3341_v4 = vld [vmem:[%s4424_s1 + $0x30] ss:$8 sps:$4 sm:$0xff] (!%p441_p9)  }
  0x11   : > { %583 = vmatprep.mubr.bf16.mxu0 (!%p441_p9), %v3636_v2  ;;  %1097 = vmatprep.mubr.bf16.mxu1 (!%p441_p9), %v3636_v2  ;;  %v3344_v5 = vld [vmem:[%s4424_s1 + $0x4] ss:$8 sps:$4 sm:$0xff] (!%p441_p9)   ;;  %vm508_vm0 = vsmask.f32 (!%p441_p9), 7424  ;;  %vm544_vm1 = vcmask (!%p441_p9), 261120   ;;  %vm884_vm2 = vcmask (!%p441_p9), 1045504  }
  0x12   : > { %552 = vmatpush1.bf16.msra.mxu0 (!%p441_p9), %v3338_v1  ;;  %v3342_v18 = vld [vmem:[%s4424_s1] ss:$8 sps:$4 sm:$0xff] (!%p441_p9)   ;;  %v3347_v20 = vld [vmem:[%s4424_s1 + $0x14] ss:$8 sps:$4 sm:$0xff] (!%p441_p9)   ;;  %v3345_v23 = vld [vmem:[%s4424_s1 + $0x10] ss:$8 sps:$4 sm:$0xff] (!%p441_p9)  }
  0x13   : > { %553 = vmatprep.subr.bf16.mxu0 (!%p441_p9), %v3339_v3  ;;  %v3350_v25 = vld [vmem:[%s4424_s1 + $0x44] ss:$8 sps:$4 sm:$0xff] (!%p441_p9)   ;;  %v3348_v28 = vld [vmem:[%s4424_s1 + $0x40] ss:$8 sps:$4 sm:$0xff] (!%p441_p9)   ;;  %v3353_v29 = vld [vmem:[%s4424_s1 + $0x54] ss:$8 sps:$4 sm:$0xff] (!%p441_p9)  }
  0x14   : > { %v3351_v30 = vld [vmem:[%s4424_s1 + $0x50] ss:$8 sps:$4 sm:$0xff] (!%p441_p9)   ;;  %v3356_v31 = vld [vmem:[%s4424_s1 + $0x64] ss:$8 sps:$4 sm:$0xff] (!%p441_p9)   ;;  %vm688_vm3 = vcmask (!%p441_p9), 1046528   ;;  %v3867_v50 = vshrl.u32 (!%p441_p9), %v977_v49, 7 }
  0x15   : > { %v3354_v38 = vld [vmem:[%s4424_s1 + $0x60] ss:$8 sps:$4 sm:$0xff] (!%p441_p9)   ;;  %v3359_v39 = vld [vmem:[%s4424_s1 + $0x74] ss:$8 sps:$4 sm:$0xff] (!%p441_p9)   ;;  %v3357_v41 = vld [vmem:[%s4424_s1 + $0x70] ss:$8 sps:$4 sm:$0xff] (!%p441_p9)  }
  0x16   : > { %554 = vmatpush1.bf16.msra.mxu0 (!%p441_p9), %v3341_v4  ;;  %v3362_v42 = vld [vmem:[%s4424_s1 + $0x84] ss:$8 sps:$4 sm:$0xff] (!%p441_p9)   ;;  %vm784_vm4 = vsmask.f32 (!%p441_p9), 6400  ;;  %v3360_v45 = vld [vmem:[%s4424_s1 + $0x80] ss:$8 sps:$4 sm:$0xff] (!%p441_p9)  }
  0x17   : > { %s488_s27 = scalar_select %p487_p10, %s3741_s22, 1  ;;  %628 = vmatprep.subr.bf16.mxu0 %v3344_v5  ;;  %v3365_v46 = vld [vmem:[%s4424_s1 + $0x94] ss:$8 sps:$4 sm:$0xff]   ;;  %v3363_v48 = vld [vmem:[%s4424_s1 + $0x90] ss:$8 sps:$4 sm:$0xff]   ;;  %v979_v51 = vsub.s32 0, %v3867_v50 }
  0x18   : > { %v975_v52 = vld [vmem:[%s4425_s2] sm:$0x3]  ;;  %v983_v53 = vsub.s32 1, %v3867_v50  ;;  %vm1054_vm5 = vcmask 228352   ;;  %vm1198_vm6 = vcmask 1043456   ;;  %vm1194_vm7 = vcmask 326656  }
  0x19   : > { %s3093_s20 = sshll.u32 %s488_s27, 5  ;;  %v980_v54 = vrot.slane %v975_v52, %v979_v51  ;;  %vm1333_vm8 = vcmask 1041408   ;;  %vm1329_vm9 = vcmask 687104   ;;  %vm1911_vm10 = vcmask 1044480   ;;  %s485_s23 = sand.u32 1, %s3626_s19  }
  0x1a   : > { %s491_s18 = scalar_lea.vmem %s4423_s0, %s3093_s20  ;;  %v984_v55 = vrot.slane %v975_v52, %v983_v53  ;;  %vm1907_vm11 = vcmask 80896   ;;  %vm3638_vm12 = vmmov 0   ;;  %vm2139_vm13 = vcmask 654336   ;;  %s3090_s24 = sshll.u32 %s3741_s22, 4 }
  0x1b   : > { %v493_v6 = vld [vmem:[%s491_s18] sm:$0xff]  ;;  %v494_v7 = vld [vmem:[%s491_s18 + $0x8] sm:$0xff]  ;;  %v495_v8 = vld [vmem:[%s491_s18 + $0x10] sm:$0xff]  ;;  %vm2584_vm14 = vcmask 982016   ;;  %vm2729_vm15 = vcmask 73728   ;;  %s486_s20 = scalar_lea.vmem [#allocation2], %s485_s23  ;;  %s4380_s25 = scalar_lea.hbm %s4438_s15, %s3090_s24 }
  0x1c   : > { %v496_v9 = vld [vmem:[%s491_s18 + $0x18] sm:$0xff]  ;;  %v501_v10 = vpack.c.bf16 %v494_v7, %v493_v6  ;;  %s2755_s18 = sshll.u32 %s486_s20, 4  ;;  %s2743_s26 = scalar_lea.sflag [#allocation3], %s485_s23  ;;  %s4382_s18 = int_to_ptr.vmem [resolvable:$true] %s2755_s18 }
  0x1d   : > { %v3790_v11 = vpack.c.bf16 %v496_v9, %v495_v8  ;;  %s3572_s30 = scalar_lea.vmem %s4382_s18, 16  ;;  %s3639_s22 = smov [#allocation2]  }
  0x1e   : > { %v510_v12 = vshrl.u32 %v501_v10, 16  ;;  %v512_v13 = vshll.u32 %v501_v10, 16  ;;  %v885_v19 = vrot.slane %v501_v10, 2  ;;  %v689_v32 = vrot.slane %v501_v10, 1  ;;  %p3573_p11 = scmp.ne.s32.totalorder %s4382_s18, %s3572_s30  ;;  %s3576_s16 = sshll.u32 %s3639_s22, 4  ;;  %s3577_s16 = int_to_ptr.vmem [resolvable:$false] %s3576_s16 }
  0x1f   : > { %v517_v14 = vshll.u32 %v3790_v11, 16  ;;  %v886_v21 = vrot.slane %v3790_v11, 2  ;;  %v521_v24 = vshrl.u32 %v3790_v11, 16  ;;  %v690_v35 = vrot.slane %v3790_v11, 1  ;;  %s3578_s17 = scalar_lea.vmem %s3577_s16, 32  ;;  %p3579_p0 = scmp.lt.s32.totalorder %s4382_s18, %s3577_s16 }
  0x20   : > { %v514_v15 = vrot.slane %v512_v13, 1  ;;  %v785_v33 = vrot.slane %v510_v12, 1  ;;  %v786_v34 = vrot.slane %v512_v13, 2  ;;  %p3574_p12 = pnand %p3573_p11, %p3758_p5  ;;  %p3580_p1 = scmp.lt.s32.totalorder %s3578_s17, %s3572_s30 }
  0x21   : > { %v519_v16 = vrot.slane %v517_v14, 1  ;;  %v887_v26 = vsel %vm884_vm2, %v885_v19, %v886_v21  ;;  %v789_v36 = vrot.slane %v517_v14, 2  ;;  %v788_v37 = vrot.slane %v521_v24, 1 }
  0x22   : > { %v515_v17 = vor.u32 %v514_v15, %v510_v12  ;;  %v691_v40 = vsel %vm688_vm3, %v689_v32, %v690_v35  ;;  %v787_v43 = vor.u32 %v786_v34, %v785_v33  ;;  %p3575_p13 = pneg %p3574_p12  ;;  %p3581_p2 = por %p3580_p1, %p3579_p0 }
  0x23   : > { %v523_v27 = vor.u32 %v521_v24, %v519_v16  ;;  %v790_v44 = vor.u32 %v789_v36, %v788_v37 }
  0x24   : > { %v520_v22 = vsel %vm508_vm0, %v515_v17, %v519_v16  ;;  %p3582_p3 = pnand %p3581_p2, %p3575_p13 }
  0x25   : > { %2824 = vmatmul.mubr.msk.bf16.vlgmr.msra.gmra.mrb[0].mxu0 %vm544_vm1, %v520_v22  ;;  %v791_v47 = vsel %vm784_vm4, %v787_v43, %v790_v44 }
  0x26   : > { %593 = vmatprep.mubr.bf16.mxu0 %v3636_v2  ;;  %629 = vmatpush1.bf16.msra.mxu0 %v3342_v18 }
  0x27   : > { %630 = vmatprep.subr.bf16.mxu0 %v3347_v20 }
  0x2a   : > { %631 = vmatpush1.bf16.msra.mxu0 %v3345_v23 }
  0x2b   : > { %718 = vmatprep.subr.bf16.mxu0 %v3350_v25 }
  0x2d   : > { %2825 = vmatmul.mubr.msk.bf16.gmra.mrb[4].mxu0 %vm544_vm1, %v523_v27 }
  0x2e   : > { %660 = vmatprep.mubr.bf16.mxu0 %v3636_v2 }
  0x35   : > { %2830 = vmatmul.mubr.msk.bf16.vlgmr.msra.gmra.mrb[0].mxu0 %vm544_vm1, %v501_v10 }
  0x36   : > { %670 = vmatprep.mubr.bf16.mxu0 %v3636_v2  ;;  %719 = vmatpush1.bf16.msra.mxu0 %v3348_v28 }
  0x37   : > { %720 = vmatprep.subr.bf16.mxu0 %v3353_v29 }
  0x3a   : > { %721 = vmatpush1.bf16.msra.mxu0 %v3351_v30 }
  0x3b   : > { %818 = vmatprep.subr.bf16.mxu0 %v3356_v31 }
  0x3d   : > { %2831 = vmatmul.mubr.msk.bf16.gmra.mrb[4].mxu0 %vm544_vm1, %v3790_v11 }
  0x3e   : > { %750 = vmatprep.mubr.bf16.mxu0 %v3636_v2 }
  0x45   : > { %2840 = vmatmul.mubr.msk.bf16.vlgmr.msra.gmra.mrb[0].mxu0 %vm544_vm1, %v691_v40 }
  0x46   : > { %760 = vmatprep.mubr.bf16.mxu0 %v3636_v2  ;;  %819 = vmatpush1.bf16.msra.mxu0 %v3354_v38 }
  0x47   : > { %820 = vmatprep.subr.bf16.mxu0 %v3359_v39 }
  0x4a   : > { %821 = vmatpush1.bf16.msra.mxu0 %v3357_v41 }
  0x4b   : > { %914 = vmatprep.subr.bf16.mxu0 %v3362_v42 }
  0x4d   : > { %2841 = vmatmul.mubr.msk.bf16.gmra.mrb[4].mxu0 %vm544_vm1, %v690_v35 }
  0x4e   : > { %850 = vmatprep.mubr.bf16.mxu0 %v3636_v2 }
  0x55   : > { %2850 = vmatmul.mubr.msk.bf16.vlgmr.msra.gmra.mrb[0].mxu0 %vm544_vm1, %v791_v47 }
  0x56   : > { %860 = vmatprep.mubr.bf16.mxu0 %v3636_v2  ;;  %915 = vmatpush1.bf16.msra.mxu0 %v3360_v45 }
  0x57   : > { %916 = vmatprep.subr.bf16.mxu0 %v3365_v46 }
  0x5a   : > { %917 = vmatpush1.bf16.msra.mxu0 %v3363_v48 }
  0x5d   : > { %2851 = vmatmul.mubr.msk.bf16.gmra.mrb[4].mxu0 %vm544_vm1, %v790_v44 }
  0x5e   : > { %946 = vmatprep.mubr.bf16.mxu0 %v3636_v2 }
  0x65   : > { %2860 = vmatmul.mubr.msk.bf16.vlgmr.msra.gmra.mrb[0].mxu0 %vm544_vm1, %v887_v26 }
  0x66   : > { %956 = vmatprep.mubr.bf16.mxu0 %v3636_v2 }
  0x6d   : > { %2861 = vmatmul.mubr.msk.bf16.gmra.mrb[4].mxu0 %vm544_vm1, %v886_v21 }
  0x6e   : > { %1950 = vmatprep.mubr.bf16.mxu0 %v3636_v2 }
 0x138   : > { %v948_v56 = vpop.f32.mrb[0].mxu0 }
 0x139   : > { %v987_v57 = vadd.f32 %v980_v54, %v948_v56  ;;  %v950_v58 = vpop.f32.mrb[1].mxu0 }
 0x13a   : > { %v988_v59 = vadd.f32 %v984_v55, %v950_v58  ;;  %v952_v60 = vpop.f32.mrb[2].mxu0  ;;  %v3367_v58 = vld [vmem:[%s4427_s4] sm:$0xff]  }
 0x13b   : > { %v995_v61 = vsub.f32 0.0, %v987_v57  ;;  %v989_v62 = vadd.f32 %v980_v54, %v952_v60  ;;  %v954_v63 = vpop.f32.mrb[3].mxu0  ;;  %v3366_v57 = vld [vmem:[%s4426_s3] sm:$0x7f]   ;;  %v3369_v60 = vld [vmem:[%s4427_s4 + $0x10] sm:$0xff]  }
 0x13c   : > { %v996_v0 = vsub.f32 0.0, %v988_v59  ;;  %v990_v1 = vadd.f32 %v984_v55, %v954_v63  ;;  %v3368_v59 = vld [vmem:[%s4427_s4 + $0x8] sm:$0xff]  }
 0x13d   : > { %v1003_v3 = vmul.f32 1.442695, %v995_v61  ;;  %v997_v4 = vsub.f32 0.0, %v989_v62  ;;  %v3370_v61 = vld [vmem:[%s4427_s4 + $0x18] sm:$0xff]   ;;  %v3371_v62 = vld [vmem:[%s4427_s4 + $0x20] sm:$0xff]   ;;  %v3372_v63 = vld [vmem:[%s4427_s4 + $0x28] sm:$0xff]  }
 0x13e   : > { %v1005_v5 = vmul.f32 1.442695, %v996_v0  ;;  %v998_v6 = vsub.f32 0.0, %v990_v1  ;;  %v3373_v0 = vld [vmem:[%s4427_s4 + $0x30] sm:$0xff]   ;;  %v3374_v1 = vld [vmem:[%s4427_s4 + $0x38] sm:$0xff]  }
 0x13f   : > { %3512 = vpow2.f32 %v1003_v3  ;;  %v1007_v7 = vmul.f32 1.442695, %v997_v4  ;;  %v3375_v3 = vld [vmem:[%s4427_s4 + $0x40] sm:$0xff]   ;;  %v3376_v4 = vld [vmem:[%s4427_s4 + $0x48] sm:$0xff]  }
 0x140   : > { %3514 = vpow2.f32 %v1005_v5  ;;  %v1009_v8 = vmul.f32 1.442695, %v998_v6  ;;  %v958_v9 = vpop.f32.mrb[4].mxu0  ;;  %v3377_v5 = vld [vmem:[%s4427_s4 + $0x50] ss:$0 sps:$4 sm:$0xff]  }
 0x141   : > { %3516 = vpow2.f32 %v1007_v7  ;;  %v991_v10 = vadd.f32 %v980_v54, %v958_v9  ;;  %v960_v11 = vpop.f32.mrb[5].mxu0  ;;  %v1200_v6 = vsel %vm1198_vm6, %v3377_v5, 0  ;;  %v3380_v7 = vld [vmem:[%s4428_s5 + $0x5c] ss:$8 sps:$4 sm:$0xff]  }
 0x142   : > { %3518 = vpow2.f32 %v1009_v8  ;;  %v992_v12 = vadd.f32 %v984_v55, %v960_v11  ;;  %v962_v13 = vpop.f32.mrb[6].mxu0 }
 0x143   : > { %v999_v14 = vsub.f32 0.0, %v991_v10  ;;  %v993_v15 = vadd.f32 %v980_v54, %v962_v13  ;;  %v964_v16 = vpop.f32.mrb[7].mxu0 }
 0x144   : > { %v1000_v17 = vsub.f32 0.0, %v992_v12  ;;  %v994_v18 = vadd.f32 %v984_v55, %v964_v16  ;;  %v3381_v16 = vld [vmem:[%s4428_s5 + $0x68] ss:$8 sps:$4 sm:$0xff]  }
 0x145   : > { %v1011_v19 = vmul.f32 1.442695, %v999_v14  ;;  %v1001_v20 = vsub.f32 0.0, %v993_v15  ;;  %v3378_v14 = vld [vmem:[%s4428_s5 + $0x58] ss:$8 sps:$4 sm:$0xff]  }
 0x146   : > { %v1013_v21 = vmul.f32 1.442695, %v1000_v17  ;;  %v1002_v22 = vsub.f32 0.0, %v994_v18  ;;  %v3383_v15 = vld [vmem:[%s4428_s5 + $0x6c] ss:$8 sps:$4 sm:$0xff]  }
 0x147   : > { %3520 = vpow2.f32 %v1011_v19  ;;  %v1015_v23 = vmul.f32 1.442695, %v1001_v20  ;;  %v3386_v17 = vld [vmem:[%s4428_s5 + $0x7c] ss:$8 sps:$4 sm:$0xff]   ;;  %v3384_v18 = vld [vmem:[%s4428_s5 + $0x78] ss:$8 sps:$4 sm:$0xff]  }
 0x148   : > { %3522 = vpow2.f32 %v1013_v21  ;;  %v1017_v24 = vmul.f32 1.442695, %v1002_v22  ;;  %v3389_v19 = vld [vmem:[%s4428_s5 + $0x8c] ss:$8 sps:$4 sm:$0xff]   ;;  %v3387_v20 = vld [vmem:[%s4428_s5 + $0x88] ss:$8 sps:$4 sm:$0xff]  }
 0x149   : > { %v3513_v25 = vpop.eup %3512  ;;  %3524 = vpow2.f32 %v1015_v23  ;;  %v3392_v21 = vld [vmem:[%s4428_s5 + $0x9c] ss:$8 sps:$4 sm:$0xff]   ;;  %v3390_v22 = vld [vmem:[%s4428_s5 + $0x98] ss:$8 sps:$4 sm:$0xff]   ;;  %v2887_v23 = vld [vmem:[%s4428_s5 + $0xa8] sm:$0x33] }
 0x14a   : > { %v3515_v26 = vpop.eup %3514  ;;  %v1019_v27 = vadd.f32 1.0, %v3513_v25  ;;  %3526 = vpow2.f32 %v1017_v24  ;;  %v2899_v24 = vcombine.high %v2887_v23, %v2887_v23  ;;  %v2898_v25 = vcombine.low %v2887_v23, %v2887_v23  ;;  %v3446_v23 = vld [vmem:[%s4428_s5 + $0x160] ss:$8 sps:$4 sm:$0xff]  }
 0x14b   : > { %v3517_v28 = vpop.eup %3516  ;;  %v1020_v29 = vadd.f32 1.0, %v3515_v26  ;;  %v3397_v26 = vld [vmem:[%s4428_s5 + $0x4] ss:$8 sps:$4 sm:$0xff]  }
 0x14c   : > { %v3519_v30 = vpop.eup %3518  ;;  %3528 = vrcp.f32 %v1019_v27  ;;  %v1021_v31 = vadd.f32 1.0, %v3517_v28  ;;  %v1335_v27 = vsel %vm1333_vm8, %v2898_v25, 0  ;;  %v3449_v25 = vld [vmem:[%s4428_s5 + $0x170] ss:$8 sps:$4 sm:$0xff]  }
 0x14d   : > { %3530 = vrcp.f32 %v1020_v29  ;;  %v1022_v32 = vadd.f32 1.0, %v3519_v30 }
 0x14e   : > { %3532 = vrcp.f32 %v1021_v31 }
 0x14f   : > { %3534 = vrcp.f32 %v1022_v32 }
 0x151   : > { %v3521_v33 = vpop.eup %3520 }
 0x152   : > { %v3523_v34 = vpop.eup %3522  ;;  %v1023_v35 = vadd.f32 1.0, %v3521_v33 }
 0x153   : > { %v3525_v36 = vpop.eup %3524  ;;  %v1024_v37 = vadd.f32 1.0, %v3523_v34 }
 0x154   : > { %v3527_v38 = vpop.eup %3526  ;;  %3536 = vrcp.f32 %v1023_v35  ;;  %v1025_v39 = vadd.f32 1.0, %v3525_v36 }
 0x155   : > { %3538 = vrcp.f32 %v1024_v37  ;;  %v1026_v40 = vadd.f32 1.0, %v3527_v38  ;;  %v3395_v38 = vld [vmem:[%s4428_s5] ss:$8 sps:$4 sm:$0xff]  }
 0x156   : > { %v3529_v41 = vpop.eup %3528  ;;  %3540 = vrcp.f32 %v1025_v39 }
 0x157   : > { %v3531_v42 = vpop.eup %3530  ;;  %3542 = vrcp.f32 %v1026_v40  ;;  %v3400_v40 = vld [vmem:[%s4428_s5 + $0x14] ss:$8 sps:$4 sm:$0xff]  }
 0x158   : > { %v3533_v43 = vpop.eup %3532 }
 0x159   : > { %v3535_v44 = vpop.eup %3534  ;;  %v1045_v45 = vpack.c.bf16 %v3533_v43, %v3529_v41  ;;  %v3403_v43 = vld [vmem:[%s4428_s5 + $0x24] ss:$8 sps:$4 sm:$0xff]  }
 0x15a   : > { %v1046_v46 = vpack.c.bf16 %v3535_v44, %v3531_v42  ;;  %v3398_v42 = vld [vmem:[%s4428_s5 + $0x10] ss:$8 sps:$4 sm:$0xff]   ;;  %v3401_v44 = vld [vmem:[%s4428_s5 + $0x20] ss:$8 sps:$4 sm:$0xff]  }
 0x15c   : > { %1065 = vmatprep.subr.bf16.mxu1 %v1046_v46  ;;  %v3404_v46 = vld [vmem:[%s4428_s5 + $0x30] ss:$8 sps:$4 sm:$0xff]  }
 0x15d   : > { %1066 = vmatpush1.bf16.msra.mxu1 %v1045_v45  ;;  %v3406_v45 = vld [vmem:[%s4428_s5 + $0x34] ss:$8 sps:$4 sm:$0xff]  }
 0x15e   : > { %v3537_v47 = vpop.eup %3536 }
 0x15f   : > { %v3539_v48 = vpop.eup %3538 }
 0x160   : > { %v3541_v49 = vpop.eup %3540 }
 0x161   : > { %v3543_v52 = vpop.eup %3542  ;;  %v1047_v54 = vpack.c.bf16 %v3541_v49, %v3537_v47  ;;  %v3409_v47 = vld [vmem:[%s4428_s5 + $0x44] ss:$8 sps:$4 sm:$0xff]   ;;  %v3407_v49 = vld [vmem:[%s4428_s5 + $0x40] ss:$8 sps:$4 sm:$0xff]  }
 0x162   : > { %v1048_v55 = vpack.c.bf16 %v3543_v52, %v3539_v48  ;;  %v1253_v48 = vld [vmem:[%s4428_s5 + $0x50] sm:$0x33] }
 0x163   : > { %v1060_v56 = vsel %vm884_vm2, %v1047_v54, 0  ;;  %v2913_v52 = vcombine.high %v1253_v48, %v1253_v48  ;;  %v2912_v54 = vcombine.low %v1253_v48, %v1253_v48 }
 0x164   : > { %2863 = vmatprep.subr.msk.bf16.mxu1 %vm884_vm2, %v1048_v55 }
 0x165   : > { %1068 = vmatpush1.bf16.msra.mxu1 %v1060_v56  ;;  %v1441_v55 = vsel %vm1333_vm8, %v2912_v54, 0  ;;  %v3414_v56 = vld [vmem:[%s4428_s5 + $0xb4] ss:$8 sps:$4 sm:$0xff]  }
 0x166   : > { %1202 = vmatprep.subr.bf16.mxu1 %v3636_v2 }
 0x168   : > { %2864 = vmatmul.mubr.msk.bf16.vlgmr.msra.gmra.mrb[0].mxu1 %vm1054_vm5, %v3366_v57  ;;  %v3412_v57 = vld [vmem:[%s4428_s5 + $0xb0] ss:$8 sps:$4 sm:$0xff]  }
 0x169   : > { %1203 = vmatpush1.bf16.msra.mxu1 %v3367_v58  ;;  %v3417_v58 = vld [vmem:[%s4428_s5 + $0xc4] ss:$8 sps:$4 sm:$0xff]  }
 0x16a   : > { %1204 = vmatprep.subr.bf16.mxu1 %v3636_v2 }
 0x16d   : > { %1205 = vmatpush1.bf16.msra.mxu1 %v3368_v59  ;;  %v3415_v59 = vld [vmem:[%s4428_s5 + $0xc0] ss:$8 sps:$4 sm:$0xff]  }
 0x16e   : > { %1206 = vmatprep.subr.bf16.mxu1 %v3636_v2 }
 0x171   : > { %1207 = vmatpush1.bf16.msra.mxu1 %v3369_v60  ;;  %v3420_v60 = vld [vmem:[%s4428_s5 + $0xd4] ss:$8 sps:$4 sm:$0xff]  }
 0x172   : > { %1208 = vmatprep.subr.bf16.mxu1 %v3636_v2 }
 0x175   : > { %1209 = vmatpush1.bf16.msra.mxu1 %v3370_v61  ;;  %v3418_v61 = vld [vmem:[%s4428_s5 + $0xd0] ss:$8 sps:$4 sm:$0xff]  }
 0x176   : > { %1210 = vmatprep.subr.bf16.mxu1 %v3636_v2 }
 0x179   : > { %1211 = vmatpush1.bf16.msra.mxu1 %v3371_v62  ;;  %v3423_v62 = vld [vmem:[%s4428_s5 + $0xe4] ss:$8 sps:$4 sm:$0xff]  }
 0x17a   : > { %1212 = vmatprep.subr.bf16.mxu1 %v3636_v2 }
 0x17d   : > { %1213 = vmatpush1.bf16.msra.mxu1 %v3372_v63  ;;  %v3421_v63 = vld [vmem:[%s4428_s5 + $0xe0] ss:$8 sps:$4 sm:$0xff]  }
 0x17e   : > { %1214 = vmatprep.subr.bf16.mxu1 %v3636_v2 }
 0x181   : > { %1215 = vmatpush1.bf16.msra.mxu1 %v3373_v0  ;;  %v3426_v0 = vld [vmem:[%s4428_s5 + $0xf4] ss:$8 sps:$4 sm:$0xff]  }
 0x182   : > { %1216 = vmatprep.subr.bf16.mxu1 %v3636_v2 }
 0x185   : > { %1217 = vmatpush1.bf16.msra.mxu1 %v3374_v1  ;;  %v2926_v1 = vld [vmem:[%s4428_s5 + $0x100] sm:$0x33] }
 0x186   : > { %1218 = vmatprep.subr.bf16.mxu1 %v3636_v2  ;;  %v2937_v5 = vcombine.low %v2926_v1, %v2926_v1 }
 0x189   : > { %1219 = vmatpush1.bf16.msra.mxu1 %v3375_v3  ;;  %v3424_v3 = vld [vmem:[%s4428_s5 + $0xf0] ss:$8 sps:$4 sm:$0xff]  }
 0x18a   : > { %1220 = vmatprep.subr.bf16.mxu1 %v3636_v2 }
 0x18d   : > { %1221 = vmatpush1.bf16.msra.mxu1 %v3376_v4  ;;  %v2938_v4 = vcombine.high %v2926_v1, %v2926_v1 }
 0x18e   : > { %1222 = vmatprep.subr.bf16.mxu1 %v3636_v2 }
 0x191   : > { %1223 = vmatpush1.bf16.msra.mxu1 %v1200_v6  ;;  %v1562_v6 = vsel %vm1333_vm8, %v2937_v5, 0 }
 0x192   : > { %1340 = vmatprep.subr.bf16.mxu1 %v3380_v7  ;;  %v3431_v7 = vld [vmem:[%s4428_s5 + $0x10c] ss:$8 sps:$4 sm:$0xff]  }
 0x23b   : > { %v1099_v8 = vpop.f32.mrb[0].mxu1 }
 0x23c   : > { %v1101_v9 = vpop.f32.mrb[1].mxu1 }
 0x23d   : > { %v1103_v10 = vpop.f32.mrb[2].mxu1 }
 0x23e   : > { %v1129_v11 = vpack.c.bf16 %v1103_v10, %v1099_v8  ;;  %v1105_v12 = vpop.f32.mrb[3].mxu1  ;;  %v3429_v8 = vld [vmem:[%s4428_s5 + $0x108] ss:$8 sps:$4 sm:$0xff]   ;;  %v3434_v10 = vld [vmem:[%s4428_s5 + $0x11c] ss:$8 sps:$4 sm:$0xff]  }
 0x23f   : > { %v1130_v13 = vpack.c.bf16 %v1105_v12, %v1101_v9  ;;  %v3437_v12 = vld [vmem:[%s4428_s5 + $0x12c] ss:$8 sps:$4 sm:$0xff]  }
 0x241   : > { %2876 = vmatprep.mubr.msk.bf16.mxu1 %vm1194_vm7, %v1130_v13  ;;  %v3435_v13 = vld [vmem:[%s4428_s5 + $0x128] ss:$8 sps:$4 sm:$0xff]  }
 0x242   : > { %1235 = vmatmul.mubr.bf16.vlgmr.msra.gmra.mrb[4].mxu1 %v1129_v11  ;;  %v3432_v11 = vld [vmem:[%s4428_s5 + $0x118] ss:$8 sps:$4 sm:$0xff]  }
 0x243   : > { %1341 = vmatpush1.bf16.msra.mxu1 %v3378_v14  ;;  %1372 = vmatprep.mubr.bf16.mxu1 %v3636_v2  ;;  %v3440_v14 = vld [vmem:[%s4428_s5 + $0x13c] ss:$8 sps:$4 sm:$0xff]  }
 0x244   : > { %1342 = vmatprep.subr.bf16.mxu1 %v3383_v15  ;;  %v3438_v15 = vld [vmem:[%s4428_s5 + $0x138] ss:$8 sps:$4 sm:$0xff]  }
 0x247   : > { %1343 = vmatpush1.bf16.msra.mxu1 %v3381_v16  ;;  %v3443_v16 = vld [vmem:[%s4428_s5 + $0x14c] ss:$8 sps:$4 sm:$0xff]  }
 0x248   : > { %1344 = vmatprep.subr.bf16.mxu1 %v3386_v17  ;;  %v2951_v17 = vld [vmem:[%s4428_s5 + $0x158] sm:$0x33] }
 0x24b   : > { %1345 = vmatpush1.bf16.msra.mxu1 %v3384_v18  ;;  %v3441_v18 = vld [vmem:[%s4428_s5 + $0x148] ss:$8 sps:$4 sm:$0xff]  }
 0x24c   : > { %1346 = vmatprep.subr.bf16.mxu1 %v3389_v19  ;;  %v2963_v19 = vcombine.high %v2951_v17, %v2951_v17 }
 0x24f   : > { %1347 = vmatpush1.bf16.msra.mxu1 %v3387_v20  ;;  %v2962_v20 = vcombine.low %v2951_v17, %v2951_v17  ;;  %v3471_v17 = vld [vmem:[%s4431_s8 + $0x40] sm:$0xff]  }
 0x250   : > { %1348 = vmatprep.subr.bf16.mxu1 %v3392_v21 }
 0x251   : > { %v1688_v21 = vsel %vm1333_vm8, %v2962_v20, 0  ;;  %v3476_v20 = vld [vmem:[%s4432_s9 + $0x78] sm:$0xff]  }
 0x253   : > { %1349 = vmatpush1.bf16.msra.mxu1 %v3390_v22  ;;  %v3448_v22 = vld [vmem:[%s4428_s5 + $0x164] ss:$8 sps:$4 sm:$0xff]  }
 0x254   : > { %2900 = vmatprep.subr.msk.bf16.mxu1 %vm1333_vm8, %v2899_v24  ;;  %v3451_v24 = vld [vmem:[%s4428_s5 + $0x174] ss:$8 sps:$4 sm:$0xff]  }
 0x257   : > { %1351 = vmatpush1.bf16.msra.mxu1 %v1335_v27  ;;  %v3452_v27 = vld [vmem:[%s4428_s5 + $0x180] ss:$8 sps:$4 sm:$0xff]  }
 0x258   : > { %1446 = vmatprep.subr.bf16.mxu1 %v3397_v26  ;;  %v3454_v26 = vld [vmem:[%s4428_s5 + $0x184] ss:$8 sps:$4 sm:$0xff]  }
 0x315   : > { %v1236_v28 = vpop.f32.mrb[4].mxu1 }
 0x316   : > { %v1238_v29 = vpop.f32.mrb[5].mxu1 }
 0x317   : > { %v1239_v30 = vpop.f32.mrb[6].mxu1  ;;  %v3455_v29 = vld [vmem:[%s4428_s5 + $0x190] ss:$8 sps:$4 sm:$0xff]  }
 0x318   : > { %v3967_v31 = vpack.c.bf16 %v1239_v30, %v1236_v28  ;;  %v1241_v32 = vpop.f32.mrb[7].mxu1  ;;  %v3457_v28 = vld [vmem:[%s4428_s5 + $0x194] ss:$8 sps:$4 sm:$0xff]   ;;  %v3460_v30 = vld [vmem:[%s4428_s5 + $0x1a4] ss:$8 sps:$4 sm:$0xff]  }
 0x319   : > { %v2976_v32 = vld [vmem:[%s4428_s5 + $0x1b0] sm:$0x33] }
 0x31a   : > { %v1268_v33 = vshrl.u32 %v3967_v31, 16  ;;  %v1270_v34 = vshll.u32 %v3967_v31, 16  ;;  %v1502_v9 = vrot.slane %v3967_v31, 1 }
 0x31c   : > { %v1272_v35 = vrot.slane %v1270_v34, 1  ;;  %v3971_v36 = vrot.slane %v1268_v33, 1  ;;  %v3973_v37 = vrot.slane %v1270_v34, 2  ;;  %v2988_v34 = vcombine.high %v2976_v32, %v2976_v32 }
 0x31e   : > { %v1273_v39 = vor.u32 %v1272_v35, %v1268_v33  ;;  %v1628_v41 = vor.u32 %v3973_v37, %v3971_v36  ;;  %v3458_v33 = vld [vmem:[%s4428_s5 + $0x1a0] ss:$8 sps:$4 sm:$0xff]   ;;  %v2987_v35 = vcombine.low %v2976_v32, %v2976_v32  ;;  %v1752_v37 = vrot.slane %v3967_v31, 2 }
 0x31f   : > { %v3480_v32 = vld [vmem:[%s4432_s9 + $0x88] sm:$0xff]  }
 0x320   : > { %2901 = vmatmul.mubr.msk.bf16.vlgmr.msra.gmra.mrb[8].mxu1 %vm1329_vm9, %v1273_v39  ;;  %v1812_v36 = vsel %vm1333_vm8, %v2987_v35, 0  ;;  %v3484_v35 = vld [vmem:[%s4432_s9 + $0x98] sm:$0xff]  }
 0x321   : > { %1447 = vmatpush1.bf16.msra.mxu1 %v3395_v38  ;;  %1478 = vmatprep.mubr.bf16.mxu1 %v3636_v2  ;;  %v1864_v38 = vld [vmem:[%s4429_s6] sm:$0x3] }
 0x322   : > { %1448 = vmatprep.subr.bf16.mxu1 %v3400_v40  ;;  %v1869_v39 = vrot.slane %v1864_v38, %v979_v51  ;;  %v1873_v40 = vrot.slane %v1864_v38, %v983_v53 }
 0x325   : > { %1449 = vmatpush1.bf16.msra.mxu1 %v3398_v42 }
 0x326   : > { %1450 = vmatprep.subr.bf16.mxu1 %v3403_v43 }
 0x329   : > { %1451 = vmatpush1.bf16.msra.mxu1 %v3401_v44 }
 0x32a   : > { %1452 = vmatprep.subr.bf16.mxu1 %v3406_v45 }
 0x32d   : > { %1453 = vmatpush1.bf16.msra.mxu1 %v3404_v46 }
 0x32e   : > { %1454 = vmatprep.subr.bf16.mxu1 %v3409_v47 }
 0x331   : > { %1455 = vmatpush1.bf16.msra.mxu1 %v3407_v49 }
 0x332   : > { %2914 = vmatprep.subr.msk.bf16.mxu1 %vm1333_vm8, %v2913_v52 }
 0x335   : > { %1457 = vmatpush1.bf16.msra.mxu1 %v1441_v55 }
 0x336   : > { %1567 = vmatprep.subr.bf16.mxu1 %v3414_v56 }
 0x338   : > { %2915 = vmatmul.mubr.msk.bf16.vlgmr.msra.gmra.mrb[8].mxu1 %vm1329_vm9, %v3967_v31 }
 0x339   : > { %1568 = vmatpush1.bf16.msra.mxu1 %v3412_v57  ;;  %1599 = vmatprep.mubr.bf16.mxu1 %v3636_v2 }
 0x33a   : > { %1569 = vmatprep.subr.bf16.mxu1 %v3417_v58 }
 0x33d   : > { %1570 = vmatpush1.bf16.msra.mxu1 %v3415_v59 }
 0x33e   : > { %1571 = vmatprep.subr.bf16.mxu1 %v3420_v60 }
 0x341   : > { %1572 = vmatpush1.bf16.msra.mxu1 %v3418_v61 }
 0x342   : > { %1573 = vmatprep.subr.bf16.mxu1 %v3423_v62 }
 0x345   : > { %1574 = vmatpush1.bf16.msra.mxu1 %v3421_v63 }
 0x346   : > { %1575 = vmatprep.subr.bf16.mxu1 %v3426_v0 }
 0x349   : > { %1576 = vmatpush1.bf16.msra.mxu1 %v3424_v3 }
 0x34a   : > { %2939 = vmatprep.subr.msk.bf16.mxu1 %vm1333_vm8, %v2938_v4 }
 0x34d   : > { %1578 = vmatpush1.bf16.msra.mxu1 %v1562_v6 }
 0x34e   : > { %1693 = vmatprep.subr.bf16.mxu1 %v3431_v7 }
 0x350   : > { %2940 = vmatmul.mubr.msk.bf16.vlgmr.msra.gmra.mrb[8].mxu1 %vm1329_vm9, %v1502_v9  ;;  %v3463_v9 = vld [vmem:[%s4431_s8] sm:$0xff]  }
 0x351   : > { %1694 = vmatpush1.bf16.msra.mxu1 %v3429_v8  ;;  %1725 = vmatprep.mubr.bf16.mxu1 %v3636_v2  ;;  %v1904_v8 = vld [vmem:[%s4430_s7] sm:$0x7] }
 0x352   : > { %1695 = vmatprep.subr.bf16.mxu1 %v3434_v10  ;;  %v3464_v10 = vld [vmem:[%s4431_s8 + $0x8] sm:$0xff]  }
 0x355   : > { %1696 = vmatpush1.bf16.msra.mxu1 %v3432_v11  ;;  %v3465_v11 = vld [vmem:[%s4431_s8 + $0x10] sm:$0xff]  }
 0x356   : > { %1697 = vmatprep.subr.bf16.mxu1 %v3437_v12  ;;  %v3466_v12 = vld [vmem:[%s4431_s8 + $0x18] sm:$0xff]  }
 0x359   : > { %1698 = vmatpush1.bf16.msra.mxu1 %v3435_v13  ;;  %v3467_v13 = vld [vmem:[%s4431_s8 + $0x20] sm:$0xff]  }
 0x35a   : > { %1699 = vmatprep.subr.bf16.mxu1 %v3440_v14  ;;  %v3468_v14 = vld [vmem:[%s4431_s8 + $0x28] sm:$0xff]  }
 0x35d   : > { %1700 = vmatpush1.bf16.msra.mxu1 %v3438_v15  ;;  %v3469_v15 = vld [vmem:[%s4431_s8 + $0x30] sm:$0xff]  }
 0x35e   : > { %1701 = vmatprep.subr.bf16.mxu1 %v3443_v16  ;;  %v3470_v16 = vld [vmem:[%s4431_s8 + $0x38] sm:$0xff]  }
 0x361   : > { %1702 = vmatpush1.bf16.msra.mxu1 %v3441_v18  ;;  %v3472_v18 = vld [vmem:[%s4431_s8 + $0x48] sm:$0xff]  }
 0x362   : > { %2964 = vmatprep.subr.msk.bf16.mxu1 %vm1333_vm8, %v2963_v19  ;;  %v3637_v19 = vmov 0.0  }
 0x365   : > { %1704 = vmatpush1.bf16.msra.mxu1 %v1688_v21 }
 0x366   : > { %1817 = vmatprep.subr.bf16.mxu1 %v3448_v22 }
 0x368   : > { %2965 = vmatmul.mubr.msk.bf16.vlgmr.msra.gmra.mrb[8].mxu1 %vm1329_vm9, %v1628_v41 }
 0x369   : > { %1818 = vmatpush1.bf16.msra.mxu1 %v3446_v23  ;;  %1849 = vmatprep.mubr.bf16.mxu1 %v3636_v2 }
 0x36a   : > { %1819 = vmatprep.subr.bf16.mxu1 %v3451_v24  ;;  %v3473_v24 = vld [vmem:[%s4432_s9 + $0x28] sm:$0xff]  }
 0x36d   : > { %1820 = vmatpush1.bf16.msra.mxu1 %v3449_v25 }
 0x36e   : > { %1821 = vmatprep.subr.bf16.mxu1 %v3454_v26 }
 0x371   : > { %1822 = vmatpush1.bf16.msra.mxu1 %v3452_v27  ;;  %v3474_v27 = vld [vmem:[%s4432_s9 + $0x30] sm:$0xff]  }
 0x372   : > { %1823 = vmatprep.subr.bf16.mxu1 %v3457_v28  ;;  %v3475_v28 = vld [vmem:[%s4432_s9 + $0x38] sm:$0xff]  }
 0x375   : > { %1824 = vmatpush1.bf16.msra.mxu1 %v3455_v29  ;;  %v3477_v29 = vld [vmem:[%s4432_s9 + $0x40] sm:$0xff]  }
 0x376   : > { %1825 = vmatprep.subr.bf16.mxu1 %v3460_v30  ;;  %v3478_v30 = vld [vmem:[%s4432_s9 + $0x80] sm:$0xff]  }
 0x379   : > { %1826 = vmatpush1.bf16.msra.mxu1 %v3458_v33  ;;  %v3479_v33 = vld [vmem:[%s4432_s9 + $0x48] sm:$0xff]  }
 0x37a   : > { %2989 = vmatprep.subr.msk.bf16.mxu1 %vm1333_vm8, %v2988_v34  ;;  %v3482_v34 = vld [vmem:[%s4432_s9 + $0x90] sm:$0xff]  }
 0x37d   : > { %1828 = vmatpush1.bf16.msra.mxu1 %v1812_v36 }
 0x37e   : > { %3182 = vmatprep.subr.bf16.mxu1 %v3637_v19 }
 0x380   : > { %2990 = vmatmul.mubr.msk.bf16.vlgmr.msra.gmra.mrb[8].mxu1 %vm1329_vm9, %v1752_v37 }
 0x381   : > { %3183 = vmatpush3.bf16.msra.mxu1 %v3476_v20  ;;  %3192 = vmatprep.mubr.msk.bf16.mxu1 %vm3638_vm12, %v3637_v19 }
 0x382   : > { %3184 = vmatprep.subr.bf16.mxu1 %v3637_v19 }
 0x385   : > { %3185 = vmatpush3.bf16.msra.mxu1 %v3478_v30 }
 0x386   : > { %3186 = vmatprep.subr.bf16.mxu1 %v3637_v19 }
 0x389   : > { %3187 = vmatpush3.bf16.msra.mxu1 %v3480_v32 }
 0x38a   : > { %3188 = vmatprep.subr.bf16.mxu1 %v3637_v19 }
 0x38d   : > { %3189 = vmatpush3.bf16.msra.mxu1 %v3482_v34 }
 0x38e   : > { %3190 = vmatprep.subr.bf16.mxu1 %v3637_v19 }
 0x391   : > { %3191 = vmatpush3.bf16.msra.mxu1 %v3484_v35 }
 0x392   : > { %3210 = vmatprep.subr.bf16.mxu1 %v3637_v19 }
 0x453   : > { %v1851_v41 = vpop.f32.mrb[8].mxu1 }
 0x454   : > { %v1876_v42 = vadd.f32 %v1869_v39, %v1851_v41  ;;  %v1853_v43 = vpop.f32.mrb[9].mxu1 }
 0x455   : > { %v1877_v44 = vadd.f32 %v1873_v40, %v1853_v43  ;;  %v1855_v45 = vpop.f32.mrb[10].mxu1 }
 0x456   : > { %v1880_v46 = vsub.f32 0.0, %v1876_v42  ;;  %v1878_v47 = vadd.f32 %v1869_v39, %v1855_v45  ;;  %v1857_v31 = vpop.f32.mrb[11].mxu1  ;;  %v3481_v39 = vld [vmem:[%s4432_s9] sm:$0xff]   ;;  %v3485_v45 = vld [vmem:[%s4432_s9 + $0x10] sm:$0xff]  }
 0x457   : > { %v1881_v48 = vsub.f32 0.0, %v1877_v44  ;;  %v1879_v49 = vadd.f32 %v1873_v40, %v1857_v31  ;;  %v3483_v44 = vld [vmem:[%s4432_s9 + $0x8] sm:$0xff]   ;;  %v3488_v31 = vld [vmem:[%s4432_s9 + $0x50] sm:$0xff]  }
 0x458   : > { %v1884_v52 = vmul.f32 1.442695, %v1880_v46  ;;  %v1882_v54 = vsub.f32 0.0, %v1878_v47  ;;  %v3486_v46 = vld [vmem:[%s4432_s9 + $0x18] sm:$0xff]   ;;  %v3487_v47 = vld [vmem:[%s4432_s9 + $0x20] sm:$0xff]  }
 0x459   : > { %v1886_v55 = vmul.f32 1.442695, %v1881_v48  ;;  %v1883_v56 = vsub.f32 0.0, %v1879_v49  ;;  %v3489_v48 = vld [vmem:[%s4432_s9 + $0x58] sm:$0xff]   ;;  %v3490_v49 = vld [vmem:[%s4432_s9 + $0x60] sm:$0xff]  }
 0x45a   : > { %3544 = vpow2.f32 %v1884_v52  ;;  %v1888_v57 = vmul.f32 1.442695, %v1882_v54  ;;  %v3491_v52 = vld [vmem:[%s4432_s9 + $0x68] sm:$0xff]   ;;  %v3492_v54 = vld [vmem:[%s4432_s9 + $0x70] sm:$0xff]  }
 0x45b   : > { %3546 = vpow2.f32 %v1886_v55  ;;  %v1890_v51 = vmul.f32 1.442695, %v1883_v56  ;;  %v3493_v55 = vld [vmem:[%s4432_s9 + $0xa0] sm:$0xff]  }
 0x45c   : > { %3548 = vpow2.f32 %v1888_v57  ;;  %v3494_v57 = vld [vmem:[%s4432_s9 + $0xa8] sm:$0xff]  }
 0x45d   : > { %3550 = vpow2.f32 %v1890_v51  ;;  %v3495_v51 = vld [vmem:[%s4432_s9 + $0xb0] sm:$0xff]  }
 0x464   : > { %v3545_v50 = vpop.eup %3544 }
 0x465   : > { %v3547_v53 = vpop.eup %3546  ;;  %v1892_v58 = vadd.f32 1.0, %v3545_v50  ;;  %v3496_v50 = vld [vmem:[%s4432_s9 + $0xb8] sm:$0xff]  }
 0x466   : > { %v3549_v59 = vpop.eup %3548  ;;  %v1893_v60 = vadd.f32 1.0, %v3547_v53  ;;  %v3497_v53 = vld [vmem:[%s4432_s9 + $0xc0] sm:$0xff]  }
 0x467   : > { %v3551_v61 = vpop.eup %3550  ;;  %3552 = vrcp.f32 %v1892_v58  ;;  %v1894_v62 = vadd.f32 1.0, %v3549_v59  ;;  %v3498_v59 = vld [vmem:[%s4434_s11] sm:$0xff]  }
 0x468   : > { %3554 = vrcp.f32 %v1893_v60  ;;  %v1895_v63 = vadd.f32 1.0, %v3551_v61  ;;  %v3499_v60 = vld [vmem:[%s4434_s11 + $0x8] sm:$0xff]   ;;  %v3500_v61 = vld [vmem:[%s4434_s11 + $0x10] sm:$0xff]  }
 0x469   : > { %3556 = vrcp.f32 %v1894_v62  ;;  %v3501_v62 = vld [vmem:[%s4434_s11 + $0x18] sm:$0xff]  }
 0x46a   : > { %3558 = vrcp.f32 %v1895_v63  ;;  %v3502_v63 = vld [vmem:[%s4434_s11 + $0x20] sm:$0xff]  }
 0x471   : > { %v3553_v0 = vpop.eup %3552 }
 0x472   : > { %v3555_v1 = vpop.eup %3554 }
 0x473   : > { %v3557_v3 = vpop.eup %3556 }
 0x474   : > { %v3559_v4 = vpop.eup %3558  ;;  %v1905_v5 = vpack.c.bf16 %v3557_v3, %v3553_v0  ;;  %v3503_v0 = vld [vmem:[%s4434_s11 + $0x28] sm:$0xff]   ;;  %v3505_v3 = vld [vmem:[%s4434_s11 + $0x38] ss:$0 sps:$4 sm:$0xff]  }
 0x475   : > { %v1906_v6 = vpack.c.bf16 %v3559_v4, %v3555_v1  ;;  %v3504_v1 = vld [vmem:[%s4434_s11 + $0x30] sm:$0xff]   ;;  %v2589_v4 = vsel %vm1198_vm6, %v3505_v3, 0 }
 0x476   : > { %v1913_v7 = vsel %vm1911_vm10, %v1905_v5, 0 }
 0x477   : > { %2991 = vmatprep.subr.msk.bf16.mxu0 %vm1911_vm10, %v1906_v6 }
 0x478   : > { %1919 = vmatpush1.bf16.msra.mxu0 %v1913_v7 }
 0x479   : > { %2044 = vmatprep.subr.bf16.mxu0 %v3636_v2 }
 0x47b   : > { %2992 = vmatmul.mubr.msk.bf16.vlgmr.msra.gmra.mrb[8].mxu0 %vm1907_vm11, %v1904_v8 }
 0x47c   : > { %2045 = vmatpush1.bf16.msra.mxu0 %v3463_v9 }
 0x47d   : > { %2046 = vmatprep.subr.bf16.mxu0 %v3636_v2 }
 0x480   : > { %2047 = vmatpush1.bf16.msra.mxu0 %v3464_v10 }
 0x481   : > { %2048 = vmatprep.subr.bf16.mxu0 %v3636_v2 }
 0x484   : > { %2049 = vmatpush1.bf16.msra.mxu0 %v3465_v11 }
 0x485   : > { %2050 = vmatprep.subr.bf16.mxu0 %v3636_v2 }
 0x488   : > { %2051 = vmatpush1.bf16.msra.mxu0 %v3466_v12 }
 0x489   : > { %2052 = vmatprep.subr.bf16.mxu0 %v3636_v2 }
 0x48c   : > { %2053 = vmatpush1.bf16.msra.mxu0 %v3467_v13 }
 0x48d   : > { %2054 = vmatprep.subr.bf16.mxu0 %v3636_v2 }
 0x490   : > { %2055 = vmatpush1.bf16.msra.mxu0 %v3468_v14 }
 0x491   : > { %2056 = vmatprep.subr.bf16.mxu0 %v3636_v2 }
 0x494   : > { %2057 = vmatpush1.bf16.msra.mxu0 %v3469_v15 }
 0x495   : > { %2058 = vmatprep.subr.bf16.mxu0 %v3636_v2 }
 0x498   : > { %2059 = vmatpush1.bf16.msra.mxu0 %v3470_v16 }
 0x499   : > { %2060 = vmatprep.subr.bf16.mxu0 %v3636_v2 }
 0x49c   : > { %2061 = vmatpush1.bf16.msra.mxu0 %v3471_v17 }
 0x49d   : > { %2062 = vmatprep.subr.bf16.mxu0 %v3636_v2 }
 0x4a0   : > { %2063 = vmatpush1.bf16.msra.mxu0 %v3472_v18 }
 0x4a1   : > { %3140 = vmatprep.subr.bf16.mxu0 %v3637_v19 }
 0x54e   : > { %v1952_v21 = vpop.f32.mrb[8].mxu0 }
 0x54f   : > { %v1954_v22 = vpop.f32.mrb[9].mxu0  ;;  %v1979_v25 = vpack.c.bf16 %v1952_v21, %v1952_v21 }
 0x550   : > { %v1980_v2 = vpack.c.bf16 %v1954_v22, %v1954_v22  ;;  %v1956_v23 = vpop.f32.mrb[10].mxu0 }
 0x551   : > { %v1957_v26 = vpop.f32.mrb[11].mxu0 }
 0x552   : > { %3003 = vmatprep.mubr.msk.bf16.mxu0 %vm544_vm1, %v1980_v2 }
 0x553   : > { %2077 = vmatmul.mubr.bf16.vlgmr.msra.gmra.mrb[12].mxu0 %v1979_v25  ;;  %v2514_v25 = vld [vmem:[%s4433_s10] sm:$0x1] }
 0x554   : > { %3141 = vmatpush3.bf16.msra.mxu0 %v3473_v24  ;;  %3150 = vmatprep.mubr.msk.bf16.mxu0 %vm3638_vm12, %v3637_v19 }
 0x555   : > { %3142 = vmatprep.subr.bf16.mxu0 %v3637_v19 }
 0x558   : > { %3143 = vmatpush3.bf16.msra.mxu0 %v3474_v27 }
 0x559   : > { %3144 = vmatprep.subr.bf16.mxu0 %v3637_v19 }
 0x55c   : > { %3145 = vmatpush3.bf16.msra.mxu0 %v3475_v28 }
 0x55d   : > { %3146 = vmatprep.subr.bf16.mxu0 %v3637_v19 }
 0x560   : > { %3147 = vmatpush3.bf16.msra.mxu0 %v3477_v29 }
 0x561   : > { %3148 = vmatprep.subr.bf16.mxu0 %v3637_v19 }
 0x564   : > { %3149 = vmatpush3.bf16.msra.mxu0 %v3479_v33 }
 0x565   : > { %3154 = vmatprep.subr.bf16.mxu0 %v3637_v19 }
 0x626   : > { %v2078_v36 = vpop.f32.mrb[12].mxu0 }
 0x627   : > { %v4226_v37 = vpack.c.bf16 %v2078_v36, %v2078_v36  ;;  %v2080_v38 = vpop.f32.mrb[13].mxu0 }
 0x628   : > { %v2081_v40 = vpop.f32.mrb[14].mxu0  ;;  %v3506_v38 = vld [vmem:[%s4436_s13] sm:$0xff]  }
 0x629   : > { %v2107_v41 = vshrl.u32 %v4226_v37, 16  ;;  %v2082_v42 = vpop.f32.mrb[15].mxu0  ;;  %v2267_v56 = vrot.slane %v4226_v37, 1  ;;  %v2439_v58 = vrot.slane %v4226_v37, 2  ;;  %v3508_v40 = vld [vmem:[%s4436_s13 + $0x10] sm:$0xff]  }
 0x62a   : > { %v3510_v42 = vld [vmem:[%s4436_s13 + $0x20] sm:$0xff]  }
 0x62b   : > { %v2353_v43 = vrot.slane %v2107_v41, 1  ;;  %3151 = vmatmul.mubr.msk.bf16.vlgmr.msra.gmra.mrb[16].mxu0 %vm2139_vm13, %v2107_v41  ;;  %v3509_v41 = vld [vmem:[%s4436_s13 + $0x18] sm:$0xff]  }
 0x62c   : > { %3155 = vmatpush3.bf16.msra.mxu0 %v3481_v39  ;;  %3164 = vmatprep.mubr.msk.bf16.mxu0 %vm3638_vm12, %v3637_v19  ;;  %v3507_v39 = vld [vmem:[%s4436_s13 + $0x8] sm:$0xff]  }
 0x62d   : > { %3156 = vmatprep.subr.bf16.mxu0 %v3637_v19  ;;  %3193 = vmatmul.mubr.msk.bf16.vlgmr.msra.gmra.mrb[12].mxu1 %vm2139_vm13, %v2353_v43  ;;  %v3511_v43 = vld [vmem:[%s4436_s13 + $0x28] ss:$0 sps:$4 sm:$0x33]  }
 0x62e   : > { %3226 = vmatprep.mubr.msk.bf16.mxu1 %vm3638_vm12, %v3637_v19  ;;  %3211 = vmatpush3.bf16.msra.mxu1 %v3498_v59 }
 0x62f   : > { %3212 = vmatprep.subr.bf16.mxu1 %v3637_v19 }
 0x630   : > { %3157 = vmatpush3.bf16.msra.mxu0 %v3483_v44  ;;  %v2687_v44 = vsel %vm1333_vm8, %v3511_v43, 0 }
 0x631   : > { %3158 = vmatprep.subr.bf16.mxu0 %v3637_v19 }
 0x632   : > { %3213 = vmatpush3.bf16.msra.mxu1 %v3499_v60 }
 0x633   : > { %3214 = vmatprep.subr.bf16.mxu1 %v3637_v19 }
 0x634   : > { %3159 = vmatpush3.bf16.msra.mxu0 %v3485_v45  ;;  %v2538_v45 = vld [vmem:[%s4435_s12] sm:$0x1] }
 0x635   : > { %3160 = vmatprep.subr.bf16.mxu0 %v3637_v19 }
 0x636   : > { %3215 = vmatpush3.bf16.msra.mxu1 %v3500_v61 }
 0x637   : > { %3216 = vmatprep.subr.bf16.mxu1 %v3637_v19 }
 0x638   : > { %3161 = vmatpush3.bf16.msra.mxu0 %v3486_v46 }
 0x639   : > { %3162 = vmatprep.subr.bf16.mxu0 %v3637_v19 }
 0x63a   : > { %3217 = vmatpush3.bf16.msra.mxu1 %v3501_v62 }
 0x63b   : > { %3218 = vmatprep.subr.bf16.mxu1 %v3637_v19 }
 0x63c   : > { %3163 = vmatpush3.bf16.msra.mxu0 %v3487_v47 }
 0x63d   : > { %3168 = vmatprep.subr.bf16.mxu0 %v3637_v19 }
 0x63e   : > { %3219 = vmatpush3.bf16.msra.mxu1 %v3502_v63 }
 0x63f   : > { %3165 = vmatmul.mubr.msk.bf16.vlgmr.msra.gmra.mrb[20].mxu0 %vm2139_vm13, %v4226_v37  ;;  %3220 = vmatprep.subr.bf16.mxu1 %v3637_v19 }
 0x640   : > { %3169 = vmatpush3.bf16.msra.mxu0 %v3488_v31  ;;  %3178 = vmatprep.mubr.msk.bf16.mxu0 %vm3638_vm12, %v3637_v19 }
 0x641   : > { %3170 = vmatprep.subr.bf16.mxu0 %v3637_v19 }
 0x642   : > { %3221 = vmatpush3.bf16.msra.mxu1 %v3503_v0 }
 0x643   : > { %3222 = vmatprep.subr.bf16.mxu1 %v3637_v19 }
 0x644   : > { %3171 = vmatpush3.bf16.msra.mxu0 %v3489_v48 }
 0x645   : > { %3172 = vmatprep.subr.bf16.mxu0 %v3637_v19 }
 0x646   : > { %3223 = vmatpush3.bf16.msra.mxu1 %v3504_v1 }
 0x647   : > { %3224 = vmatprep.subr.bf16.mxu1 %v3637_v19 }
 0x648   : > { %3173 = vmatpush3.bf16.msra.mxu0 %v3490_v49 }
 0x649   : > { %3174 = vmatprep.subr.bf16.mxu0 %v3637_v19 }
 0x64a   : > { %3225 = vmatpush3.bf16.msra.mxu1 %v2589_v4 }
 0x64c   : > { %3175 = vmatpush3.bf16.msra.mxu0 %v3491_v52 }
 0x64d   : > { %3176 = vmatprep.subr.bf16.mxu0 %v3637_v19 }
 0x650   : > { %3177 = vmatpush3.bf16.msra.mxu0 %v3492_v54 }
 0x651   : > { %3196 = vmatprep.subr.bf16.mxu0 %v3637_v19 }
 0x653   : > { %3179 = vmatmul.mubr.msk.bf16.vlgmr.msra.gmra.mrb[24].mxu0 %vm2139_vm13, %v2267_v56 }
 0x654   : > { %3197 = vmatpush3.bf16.msra.mxu0 %v3493_v55  ;;  %3206 = vmatprep.mubr.msk.bf16.mxu0 %vm3638_vm12, %v3637_v19 }
 0x655   : > { %3198 = vmatprep.subr.bf16.mxu0 %v3637_v19 }
 0x658   : > { %3199 = vmatpush3.bf16.msra.mxu0 %v3494_v57 }
 0x659   : > { %3200 = vmatprep.subr.bf16.mxu0 %v3637_v19 }
 0x65c   : > { %3201 = vmatpush3.bf16.msra.mxu0 %v3495_v51  ;;  %v2649_v51 = vld [vmem:[%s4437_s14] sm:$0x1] }
 0x65d   : > { %3202 = vmatprep.subr.bf16.mxu0 %v3637_v19 }
 0x660   : > { %3203 = vmatpush3.bf16.msra.mxu0 %v3496_v50 }
 0x661   : > { %3204 = vmatprep.subr.bf16.mxu0 %v3637_v19 }
 0x664   : > { %3205 = vmatpush3.bf16.msra.mxu0 %v3497_v53 }
 0x665   : > { %3230 = vmatprep.subr.bf16.mxu0 %v3637_v19 }
 0x667   : > { %3207 = vmatmul.mubr.msk.bf16.vlgmr.msra.gmra.mrb[28].mxu0 %vm2139_vm13, %v2439_v58 }
 0x668   : > { %3242 = vmatprep.mubr.msk.bf16.mxu0 %vm3638_vm12, %v3637_v19  ;;  %3231 = vmatpush3.bf16.msra.mxu0 %v3506_v38 }
 0x669   : > { %3232 = vmatprep.subr.bf16.mxu0 %v3637_v19 }
 0x66c   : > { %3233 = vmatpush3.bf16.msra.mxu0 %v3507_v39 }
 0x66d   : > { %3234 = vmatprep.subr.bf16.mxu0 %v3637_v19 }
 0x670   : > { %3235 = vmatpush3.bf16.msra.mxu0 %v3508_v40 }
 0x671   : > { %3236 = vmatprep.subr.bf16.mxu0 %v3637_v19 }
 0x674   : > { %3237 = vmatpush3.bf16.msra.mxu0 %v3509_v41 }
 0x675   : > { %3238 = vmatprep.subr.bf16.mxu0 %v3637_v19 }
 0x678   : > { %3239 = vmatpush3.bf16.msra.mxu0 %v3510_v42 }
 0x679   : > { %3240 = vmatprep.subr.bf16.mxu0 %v3637_v19 }
 0x67c   : > { %3241 = vmatpush3.bf16.msra.mxu0 %v2687_v44 }
 0x6fe   : > { %v2177_v5 = vpop.f32.mrb[16].mxu0 }
 0x6ff   : > { %v3152_v6 = vpop.f32.mrb[17].mxu0 }
 0x700   : > { %v2180_v7 = vpop.f32.mrb[18].mxu0  ;;  %v2421_v8 = vpop.f32.mrb[12].mxu1 }
 0x701   : > { %v3153_v9 = vpop.f32.mrb[19].mxu0  ;;  %v3194_v10 = vpop.f32.mrb[13].mxu1 }
 0x702   : > { %v2424_v11 = vpop.f32.mrb[14].mxu1 }
 0x703   : > { %v3195_v12 = vpop.f32.mrb[15].mxu1 }
 0x712   : > { %v2249_v13 = vpop.f32.mrb[20].mxu0 }
 0x713   : > { %v2250_v14 = vadd.f32 %v2249_v13, %v2177_v5  ;;  %v3166_v15 = vpop.f32.mrb[21].mxu0 }
 0x714   : > { %v2252_v16 = vpop.f32.mrb[22].mxu0 }
 0x715   : > { %v3167_v17 = vpop.f32.mrb[23].mxu0 }
 0x726   : > { %v2335_v18 = vpop.f32.mrb[24].mxu0 }
 0x727   : > { %v2341_v20 = vadd.f32 %v2335_v18, %v2250_v14  ;;  %v3180_v21 = vpop.f32.mrb[25].mxu0 }
 0x728   : > { %v2338_v22 = vpop.f32.mrb[26].mxu0 }
 0x729   : > { %v3181_v2 = vpop.f32.mrb[27].mxu0  ;;  %v2427_v23 = vadd.f32 %v2421_v8, %v2341_v20 }
 0x73a   : > { %v2507_v24 = vpop.f32.mrb[28].mxu0 }
 0x73b   : > { %v2513_v26 = vadd.f32 %v2507_v24, %v2427_v23  ;;  %v3208_v27 = vpop.f32.mrb[29].mxu0 }
 0x73c   : > { %v2510_v28 = vpop.f32.mrb[30].mxu0 }
 0x73d   : > { %v2515_v29 = vadd.f32 %v2514_v25, %v2513_v26  ;;  %v3209_v30 = vpop.f32.mrb[31].mxu0 }
 0x73f   : > { %v2516_v32 = vsub.f32 0.0, %v2515_v29 }
 0x741   : > { %v2517_v33 = vmul.f32 1.442695, %v2516_v32 }
 0x743   : > { %3560 = vpow2.f32 %v2517_v33 }
 0x74d   : > { %v3561_v34 = vpop.eup %3560 }
 0x74e   : > { %v2519_v35 = vadd.f32 1.0, %v3561_v34 }
 0x750   : > { %3562 = vrcp.f32 %v2519_v35 }
 0x75a   : > { %v3563_v36 = vpop.eup %3562 }
 0x75b   : > { %v2537_v37 = vpack.c.bf16 %v3563_v36, %v3563_v36 }
 0x75d   : > { %3227 = vmatmul.mubr.msk.bf16.vlgmr.msra.gmra.mrb[16].mxu1 %vm2584_vm14, %v2537_v37 }
 0x830   : > { %v2625_v46 = vpop.f32.mrb[16].mxu1 }
 0x831   : > { %v2626_v47 = vadd.f32 %v2625_v46, %v2538_v45  ;;  %v3228_v31 = vpop.f32.mrb[17].mxu1 }
 0x832   : > { %v2628_v48 = vpop.f32.mrb[18].mxu1 }
 0x833   : > { %v2631_v49 = vsub.f32 0.0, %v2626_v47  ;;  %v3229_v52 = vpop.f32.mrb[19].mxu1 }
 0x835   : > { %v2632_v54 = vmul.f32 1.442695, %v2631_v49 }
 0x837   : > { %3564 = vpow2.f32 %v2632_v54 }
 0x841   : > { %v3565_v19 = vpop.eup %3564 }
 0x842   : > { %v2634_v55 = vadd.f32 1.0, %v3565_v19 }
 0x844   : > { %3566 = vrcp.f32 %v2634_v55 }
 0x84e   : > { %v3567_v56 = vpop.eup %3566 }
 0x84f   : > { %v2648_v57 = vpack.c.bf16 %v3567_v56, %v3567_v56 }
 0x851   : > { %3243 = vmatmul.mubr.msk.bf16.vlgmr.msra.gmra.mrb[32].mxu0 %vm1329_vm9, %v2648_v57 }
 0x924   : > { %v2723_v50 = vpop.f32.mrb[32].mxu0 }
 0x925   : > { %v2724_v53 = vadd.f32 %v2723_v50, %v2649_v51  ;;  %v3244_v58 = vpop.f32.mrb[33].mxu0 }
 0x926   : > { %v2726_v59 = vpop.f32.mrb[34].mxu0 }
 0x927   : > { %v3245_v60 = vpop.f32.mrb[35].mxu0  ;;  %v2730_v61 = vsel %vm2729_vm15, %v2724_v53, -inf }
 0x928   : > { %2731 = vmax.xlane.f32.xlu0 %v2730_v61 }
 0x9b5   : > { %v2732_v62 = vpop.xlane.xlu0 %2731 }
 0x9b6   : > { %v2733_v63 = vsub.f32 %v2724_v53, %v2732_v62 }
 0x9b8   : > { %v2734_v0 = vmul.f32 1.442695, %v2733_v63 }
 0x9ba   : > { %3568 = vpow2.f32 %v2734_v0 }
 0x9c4   : > { %v3569_v1 = vpop.eup %3568 }
 0x9c5   : > { %v2736_v3 = vsel %vm2729_vm15, %v3569_v1, 0.0 }
 0x9c6   : > { %2737 = vadd.xlane.f32.xlu0 %v2736_v3 }
 0xa53   : > { %v2738_v4 = vpop.xlane.xlu0 %2737 }
 0xa54   : > { %3570 = vrcp.f32 %v2738_v4 }
 0xa5e   : > { %v3571_v5 = vpop.eup %3570 }
 0xa5f   : > { %v2740_v6 = vmul.f32 %v3571_v5, %v3569_v1 }
 0xa61   : > { %2741 = vst.msk [vmem:[%s486_s20] sm:$0x1] %vm2729_vm15, %v2740_v6 }
 0xa62   : > { %3585 = shalt.err (!%p3582_p3)
}
 0xa63   : > { %s3586_s23 = scalar_lea.hbm %s4380_s25, 16  ;;  %s3590_s27 = scalar_lea.hbm %s4438_s15, 32 }
 0xa64   : > { %p3587_p4 = scmp.ne.s32.totalorder %s4380_s25, %s3586_s23  ;;  %p3591_p9 = scmp.lt.u32.totalorder %s4380_s25, %s4438_s15 }
 0xa65   : > { %p3592_p10 = scmp.lt.u32.totalorder %s3590_s27, %s3586_s23  ;;  %p3594_p12 = scmp.lt.u32.totalorder %s3586_s23, %s4380_s25 }
 0xa66   : > { %p3588_p7 = pnand %p3587_p4, %p3758_p5 }
 0xa67   : > { %p3593_p11 = por %p3592_p10, %p3591_p9 }
 0xa68   : > { %p3589_p8 = pneg %p3588_p7 }
 0xa69   : > { %p3595_p13 = por %p3594_p12, %p3593_p11 }
 0xa6b   : > { %p3596_p0 = pnand %p3595_p13, %p3589_p8 }
 0xa6d   : > { %3599 = shalt.err (!%p3596_p0)
}
 0xa6e   : > { %3294 = dma.vmem_to_hbm [thread:$0]  (%p3758_p5), %s4382_s18, 16, %s4380_s25, %s2743_s26  }
 0xa6f PF: > { %s4451_s30 = sld [smem:[#allocation5_spill]]  ;;  %p3300_p1 = scmp.ge.s32.totalorder %s3634_s21, 2 }
 0xa71   : > { %p3297_p2 = pnand %p3300_p1, %p3762_p6 }
 0xa75   : > { %s2767_s17 = sand.u32 1, %s4451_s30  }
 0xa76   : > { %s2768_s24 = scalar_lea.sflag [#allocation3], %s2767_s17 }
 0xa77   : > { %3617 = dma.done.wait (!%p3297_p2), %s2768_s24, 16  }
 0xa78   : > { %3619 = vsyncadd (!%p3297_p2), %s2768_s24, 4294967280  ;;  %s4453_s21 = sld [smem:[#allocation7_spill]]  ;;  %s4454_s23 = sld [smem:[#allocation6_spill]] }
 0xa79   : > { %s4455_s20 = sld [smem:[#allocation8_spill]]  ;;  %s4456_s18 = smov %s3626_s19 }
 0xa7e   : > { %p25_p3 = scmp.ge.s32.totalorder %s4453_s21, 4   ;;  %s4457_s19 = smov %s4454_s23 }
 0xa80   :  { %27 = sbr.rel (!%p25_p3) target bundleno = 3 (0x3), region = 127 }
 0xa87   :  { %2772 = vsyncpa [#allocation3], 1 }
 0xa88   :  { %2774 = vsyncpa [#allocation3 + $0x1], 1 }

</bundles_post_ra>
